<compile_context>
chip_gen: v7x
topology: tpu7x:2x2x1
jax: 0.10.0
libtpu: 0.0.40
codegen_flags: <defaults>
</compile_context>

<pallas_src>
import jax
import jax.numpy as jnp
from jax.experimental import pallas as pl
from jax.experimental.pallas import tpu as pltpu

IN_DIM = 784
HID = 400
LATENT = 20
LAT_PAD = 128          # lane-padded latent width (one full vreg lane group)


def _round_up(n, m):
    return ((n + m - 1) // m) * m


def _vae_kernel(x_ref,
                w1_ref, b1_ref,
                wmulv_ref, bmulv_ref,
                wd1_ref, bd1_ref,
                wd2_ref, bd2_ref,
                eps_ref,
                recon_ref, latent_ref):
    bf16 = jnp.bfloat16
    x = x_ref[...]                                             # (bm, 784) f32

    # --- encoder layer 1 + ReLU (bf16 matmul operands, f32 accumulate) ---
    h1 = jnp.dot(x.astype(bf16), w1_ref[...],
                 preferred_element_type=jnp.float32) + b1_ref[...]
    h1 = jnp.maximum(h1, 0.0)                                  # (bm, 400) f32

    # --- fused mu|logvar projection: cols [0:128)=mu, [128:256)=logvar ---
    slab = jnp.dot(h1.astype(bf16), wmulv_ref[...],
                   preferred_element_type=jnp.float32) + bmulv_ref[...]
    mu = slab[:, :LAT_PAD]                                     # (bm, 128)
    logvar = slab[:, LAT_PAD:]                                 # (bm, 128)

    # --- reparameterize (padded lanes: mu=0, logvar=0 -> std=1, eps=0 -> z=0) ---
    std = jnp.exp(0.5 * logvar)
    z = mu + eps_ref[...] * std                                # (bm, 128) f32

    # --- decoder ---
    h3 = jnp.dot(z.astype(bf16), wd1_ref[...],
                 preferred_element_type=jnp.float32) + bd1_ref[...]
    h3 = jnp.maximum(h3, 0.0)                                  # (bm, 400)
    logits = jnp.dot(h3.astype(bf16), wd2_ref[...],
                     preferred_element_type=jnp.float32) + bd2_ref[...]

    recon_ref[...] = jax.nn.sigmoid(logits)                    # (bm, 784)
    latent_ref[...] = slab                                     # (bm, 256)


def _pack_params(params):
    """Build kernel-side params: bf16 weights, fused+padded mu/logvar, padded wd1."""
    (w1, b1, wmu, bmu, wlv, blv, wd1, bd1, wd2, bd2) = params
    bf16 = jnp.bfloat16

    wmulv = jnp.zeros((HID, 2 * LAT_PAD), jnp.float32)
    wmulv = wmulv.at[:, :LATENT].set(wmu)
    wmulv = wmulv.at[:, LAT_PAD:LAT_PAD + LATENT].set(wlv)
    bmulv = jnp.zeros((1, 2 * LAT_PAD), jnp.float32)
    bmulv = bmulv.at[:, :LATENT].set(bmu)
    bmulv = bmulv.at[:, LAT_PAD:LAT_PAD + LATENT].set(blv)

    wd1p = jnp.zeros((LAT_PAD, HID), jnp.float32).at[:LATENT, :].set(wd1)

    return (w1.astype(bf16), b1,
            wmulv.astype(bf16), bmulv,
            wd1p.astype(bf16), bd1,
            wd2.astype(bf16), bd2)


def vae_forward(x, params, eps, *, bm=256):
    """x: (B, ...) flattened to (B, 784); eps: (B, 20) standard-normal noise."""
    B = x.shape[0]
    x2 = x.reshape(B, IN_DIM).astype(jnp.float32)

    # Batch tile: multiple of 8 sublanes, at most `bm` rows per grid step.
    bm = min(bm, _round_up(B, 8))
    B_pad = _round_up(B, bm)
    if B_pad != B:
        x2 = jnp.pad(x2, ((0, B_pad - B), (0, 0)))
    eps_p = jnp.zeros((B_pad, LAT_PAD), jnp.float32).at[:B, :LATENT].set(
        eps.astype(jnp.float32))

    (w1, b1, wmulv, bmulv, wd1p, bd1, wd2, bd2) = _pack_params(params)

    grid = (B_pad // bm,)
    batch_map = lambda i: (i, 0)
    resident = lambda i: (0, 0)          # same block every step -> weights stay in VMEM

    in_specs = [
        pl.BlockSpec((bm, IN_DIM), batch_map),          # x
        pl.BlockSpec(w1.shape, resident),               # w1      (784, 400) bf16
        pl.BlockSpec(b1.shape, resident),               # b1      (1, 400)   f32
        pl.BlockSpec(wmulv.shape, resident),            # wmu|wlv (400, 256) bf16
        pl.BlockSpec(bmulv.shape, resident),            # bmu|blv (1, 256)   f32
        pl.BlockSpec(wd1p.shape, resident),             # wd1     (128, 400) bf16
        pl.BlockSpec(bd1.shape, resident),              # bd1     (1, 400)   f32
        pl.BlockSpec(wd2.shape, resident),              # wd2     (400, 784) bf16
        pl.BlockSpec(bd2.shape, resident),              # bd2     (1, 784)   f32
        pl.BlockSpec((bm, LAT_PAD), batch_map),         # eps
    ]
    out_specs = (
        pl.BlockSpec((bm, IN_DIM), batch_map),          # recon
        pl.BlockSpec((bm, 2 * LAT_PAD), batch_map),     # mu|logvar slab
    )
    out_shape = (
        jax.ShapeDtypeStruct((B_pad, IN_DIM), jnp.float32),
        jax.ShapeDtypeStruct((B_pad, 2 * LAT_PAD), jnp.float32),
    )

    weight_bytes = sum(int(a.size) * a.dtype.itemsize
                       for a in (w1, b1, wmulv, bmulv, wd1p, bd1, wd2, bd2))
    flops = 2 * B_pad * (IN_DIM * HID + HID * 2 * LAT_PAD + LAT_PAD * HID + HID * IN_DIM)
    transcendentals = B_pad * (LAT_PAD + IN_DIM)        # exp(logvar) + sigmoid
    bytes_accessed = (weight_bytes + int(x2.size) * 4 + int(eps_p.size) * 4
                      + B_pad * IN_DIM * 4 + B_pad * 2 * LAT_PAD * 4)

    recon_p, slab = pl.pallas_call(
        _vae_kernel,
        out_shape=out_shape,
        grid=grid,
        in_specs=in_specs,
        out_specs=out_specs,
        compiler_params=pltpu.CompilerParams(
            dimension_semantics=("parallel",)),
        cost_estimate=pl.CostEstimate(
            flops=flops,
            transcendentals=transcendentals,
            bytes_accessed=bytes_accessed),
    )(x2, w1, b1, wmulv, bmulv, wd1p, bd1, wd2, bd2, eps_p)

    recon = recon_p[:B]
    mu = slab[:B, :LATENT]
    logvar = slab[:B, LAT_PAD:LAT_PAD + LATENT]
    return recon, mu, logvar


def init_params(key):
    """PyTorch-style Linear init: U(-1/sqrt(fan_in), 1/sqrt(fan_in)).

    Weights stored as (in_features, out_features); biases as (1, out_features).
    """
    def linear(key, fan_in, fan_out):
        kw, kb = jax.random.split(key)
        bound = 1.0 / jnp.sqrt(fan_in)
        w = jax.random.uniform(kw, (fan_in, fan_out), jnp.float32, -bound, bound)
        b = jax.random.uniform(kb, (1, fan_out), jnp.float32, -bound, bound)
        return w, b

    keys = jax.random.split(key, 5)
    w1, b1 = linear(keys[0], 784, 400)     # encoder_layer1
    wmu, bmu = linear(keys[1], 400, 20)    # encoder_mu
    wlv, blv = linear(keys[2], 400, 20)    # encoder_logvar
    wd1, bd1 = linear(keys[3], 20, 400)    # decoder_layer1
    wd2, bd2 = linear(keys[4], 400, 784)   # decoder_layer2
    return (w1, b1, wmu, bmu, wlv, blv, wd1, bd1, wd2, bd2)


def vae_reference(x, params, eps):
    """Pure-JAX f32 reference of the PyTorch forward (for sanity checking)."""
    (w1, b1, wmu, bmu, wlv, blv, wd1, bd1, wd2, bd2) = params
    B = x.shape[0]
    xf = x.reshape(B, IN_DIM).astype(jnp.float32)
    h1 = jax.nn.relu(xf @ w1 + b1)
    mu = h1 @ wmu + bmu
    logvar = h1 @ wlv + blv
    std = jnp.exp(0.5 * logvar)
    z = mu + eps * std
    h3 = jax.nn.relu(z @ wd1 + bd1)
    recon = jax.nn.sigmoid(h3 @ wd2 + bd2)
    return recon, mu, logvar


if __name__ == "__main__":
    key = jax.random.PRNGKey(0)
    k_params, k_x, k_eps = jax.random.split(key, 3)

    B = 8
    params = init_params(k_params)
    # MNIST-shaped input: (B, 1, 28, 28); forward flattens to (B, 784).
    x = jax.random.uniform(k_x, (B, 1, 28, 28), jnp.float32)
    # eps is the torch.randn_like noise of reparameterize(), supplied explicitly
    # for determinism.
    eps = jax.random.normal(k_eps, (B, LATENT), jnp.float32)

    recon, mu, logvar = vae_forward(x, params, eps)
    jax.block_until_ready((recon, mu, logvar))

    assert recon.shape == (B, IN_DIM)
    assert mu.shape == (B, LATENT) and logvar.shape == (B, LATENT)

    # Sanity check against the f32 reference (bf16 weights -> generous tol).
    r_ref, mu_ref, lv_ref = vae_reference(x, params, eps)
    assert float(jnp.max(jnp.abs(recon - r_ref))) < 3e-2
    assert float(jnp.max(jnp.abs(mu - mu_ref))) < 3e-2
    assert float(jnp.max(jnp.abs(logvar - lv_ref))) < 3e-2

    print("KERNEL_OK")
</pallas_src>

<mosaic_0001>
module attributes {stable_mosaic.version = 11 : i64} {
  func.func @_vae_kernel(%arg0: i32, %arg1: memref<8x784xf32, #tpu.memory_space<vmem>>, %arg2: memref<784x400xbf16, #tpu.memory_space<vmem>>, %arg3: memref<1x400xf32, #tpu.memory_space<vmem>>, %arg4: memref<400x256xbf16, #tpu.memory_space<vmem>>, %arg5: memref<1x256xf32, #tpu.memory_space<vmem>>, %arg6: memref<128x400xbf16, #tpu.memory_space<vmem>>, %arg7: memref<1x400xf32, #tpu.memory_space<vmem>>, %arg8: memref<400x784xbf16, #tpu.memory_space<vmem>>, %arg9: memref<1x784xf32, #tpu.memory_space<vmem>>, %arg10: memref<8x128xf32, #tpu.memory_space<vmem>>, %arg11: memref<8x784xf32, #tpu.memory_space<vmem>>, %arg12: memref<8x256xf32, #tpu.memory_space<vmem>>) attributes {dimension_semantics = [#tpu.dimension_semantics<parallel>], iteration_bounds = array<i64: 1>, scalar_prefetch = 0 : i64, scratch_operands = 0 : i64, tpu.core_type = #tpu.core_type<tc>, window_params = [{transform_indices = @transform_0, window_bounds = array<i64: 8, 784>}, {pipeline_mode = #tpu.pipeline_mode<synchronous>, transform_indices = @transform_1, window_bounds = array<i64: 784, 400>}, {pipeline_mode = #tpu.pipeline_mode<synchronous>, transform_indices = @transform_2, window_bounds = array<i64: 1, 400>}, {pipeline_mode = #tpu.pipeline_mode<synchronous>, transform_indices = @transform_3, window_bounds = array<i64: 400, 256>}, {pipeline_mode = #tpu.pipeline_mode<synchronous>, transform_indices = @transform_4, window_bounds = array<i64: 1, 256>}, {pipeline_mode = #tpu.pipeline_mode<synchronous>, transform_indices = @transform_5, window_bounds = array<i64: 128, 400>}, {pipeline_mode = #tpu.pipeline_mode<synchronous>, transform_indices = @transform_6, window_bounds = array<i64: 1, 400>}, {pipeline_mode = #tpu.pipeline_mode<synchronous>, transform_indices = @transform_7, window_bounds = array<i64: 400, 784>}, {pipeline_mode = #tpu.pipeline_mode<synchronous>, transform_indices = @transform_8, window_bounds = array<i64: 1, 784>}, {transform_indices = @transform_9, window_bounds = array<i64: 8, 128>}, {transform_indices = @transform_10, window_bounds = array<i64: 8, 784>}, {transform_indices = @transform_11, window_bounds = array<i64: 8, 256>}]} {
    %c0 = arith.constant 0 : index
    %c0_0 = arith.constant 0 : index
    %0 = vector.load %arg1[%c0, %c0_0] : memref<8x784xf32, #tpu.memory_space<vmem>>, vector<8x784xf32>
    %1 = arith.truncf %0 : vector<8x784xf32> to vector<8x784xbf16>
    %c0_1 = arith.constant 0 : index
    %c0_2 = arith.constant 0 : index
    %2 = vector.load %arg2[%c0_1, %c0_2] : memref<784x400xbf16, #tpu.memory_space<vmem>>, vector<784x400xbf16>
    %cst = arith.constant dense<0.000000e+00> : vector<8x400xf32>
    %3 = tpu.matmul %1, %2, %cst {dimension_numbers = #tpu.dot_dimension_numbers<[1], [0], [0], [1], [0, 0, 1, 1], [], []>} : vector<8x784xbf16>, vector<784x400xbf16>, vector<8x400xf32> -> vector<8x400xf32>
    %c0_3 = arith.constant 0 : index
    %c0_4 = arith.constant 0 : index
    %4 = vector.load %arg3[%c0_3, %c0_4] : memref<1x400xf32, #tpu.memory_space<vmem>>, vector<1x400xf32>
    %5 = vector.broadcast %4 : vector<1x400xf32> to vector<8x400xf32>
    %6 = arith.addf %3, %5 : vector<8x400xf32>
    %cst_5 = arith.constant 0.000000e+00 : f32
    %7 = vector.broadcast %cst_5 : f32 to vector<8x400xf32>
    %8 = arith.maximumf %6, %7 : vector<8x400xf32>
    %9 = arith.truncf %8 : vector<8x400xf32> to vector<8x400xbf16>
    %c0_6 = arith.constant 0 : index
    %c0_7 = arith.constant 0 : index
    %10 = vector.load %arg4[%c0_6, %c0_7] : memref<400x256xbf16, #tpu.memory_space<vmem>>, vector<400x256xbf16>
    %cst_8 = arith.constant dense<0.000000e+00> : vector<8x256xf32>
    %11 = tpu.matmul %9, %10, %cst_8 {dimension_numbers = #tpu.dot_dimension_numbers<[1], [0], [0], [1], [0, 0, 1, 1], [], []>} : vector<8x400xbf16>, vector<400x256xbf16>, vector<8x256xf32> -> vector<8x256xf32>
    %c0_9 = arith.constant 0 : index
    %c0_10 = arith.constant 0 : index
    %12 = vector.load %arg5[%c0_9, %c0_10] : memref<1x256xf32, #tpu.memory_space<vmem>>, vector<1x256xf32>
    %13 = vector.broadcast %12 : vector<1x256xf32> to vector<8x256xf32>
    %14 = arith.addf %11, %13 : vector<8x256xf32>
    %15 = vector.extract_strided_slice %14 {offsets = [0, 0], sizes = [8, 128], strides = [1, 1]} : vector<8x256xf32> to vector<8x128xf32>
    %16 = vector.extract_strided_slice %14 {offsets = [0, 128], sizes = [8, 128], strides = [1, 1]} : vector<8x256xf32> to vector<8x128xf32>
    %cst_11 = arith.constant 5.000000e-01 : f32
    %17 = vector.broadcast %cst_11 : f32 to vector<8x128xf32>
    %18 = arith.mulf %17, %16 : vector<8x128xf32>
    %19 = math.exp %18 : vector<8x128xf32>
    %c0_12 = arith.constant 0 : index
    %c0_13 = arith.constant 0 : index
    %20 = vector.load %arg10[%c0_12, %c0_13] : memref<8x128xf32, #tpu.memory_space<vmem>>, vector<8x128xf32>
    %21 = arith.mulf %20, %19 : vector<8x128xf32>
    %22 = arith.addf %15, %21 : vector<8x128xf32>
    %23 = arith.truncf %22 : vector<8x128xf32> to vector<8x128xbf16>
    %c0_14 = arith.constant 0 : index
    %c0_15 = arith.constant 0 : index
    %24 = vector.load %arg6[%c0_14, %c0_15] : memref<128x400xbf16, #tpu.memory_space<vmem>>, vector<128x400xbf16>
    %cst_16 = arith.constant dense<0.000000e+00> : vector<8x400xf32>
    %25 = tpu.matmul %23, %24, %cst_16 {dimension_numbers = #tpu.dot_dimension_numbers<[1], [0], [0], [1], [0, 0, 1, 1], [], []>} : vector<8x128xbf16>, vector<128x400xbf16>, vector<8x400xf32> -> vector<8x400xf32>
    %c0_17 = arith.constant 0 : index
    %c0_18 = arith.constant 0 : index
    %26 = vector.load %arg7[%c0_17, %c0_18] : memref<1x400xf32, #tpu.memory_space<vmem>>, vector<1x400xf32>
    %27 = vector.broadcast %26 : vector<1x400xf32> to vector<8x400xf32>
    %28 = arith.addf %25, %27 : vector<8x400xf32>
    %cst_19 = arith.constant 0.000000e+00 : f32
    %29 = vector.broadcast %cst_19 : f32 to vector<8x400xf32>
    %30 = arith.maximumf %28, %29 : vector<8x400xf32>
    %31 = arith.truncf %30 : vector<8x400xf32> to vector<8x400xbf16>
    %c0_20 = arith.constant 0 : index
    %c0_21 = arith.constant 0 : index
    %32 = vector.load %arg8[%c0_20, %c0_21] : memref<400x784xbf16, #tpu.memory_space<vmem>>, vector<400x784xbf16>
    %cst_22 = arith.constant dense<0.000000e+00> : vector<8x784xf32>
    %33 = tpu.matmul %31, %32, %cst_22 {dimension_numbers = #tpu.dot_dimension_numbers<[1], [0], [0], [1], [0, 0, 1, 1], [], []>} : vector<8x400xbf16>, vector<400x784xbf16>, vector<8x784xf32> -> vector<8x784xf32>
    %c0_23 = arith.constant 0 : index
    %c0_24 = arith.constant 0 : index
    %34 = vector.load %arg9[%c0_23, %c0_24] : memref<1x784xf32, #tpu.memory_space<vmem>>, vector<1x784xf32>
    %35 = vector.broadcast %34 : vector<1x784xf32> to vector<8x784xf32>
    %36 = arith.addf %33, %35 : vector<8x784xf32>
    %37 = arith.negf %36 : vector<8x784xf32>
    %38 = math.exp %37 : vector<8x784xf32>
    %cst_25 = arith.constant 1.000000e+00 : f32
    %39 = vector.broadcast %cst_25 : f32 to vector<8x784xf32>
    %40 = arith.addf %39, %38 : vector<8x784xf32>
    %41 = arith.divf %39, %40 : vector<8x784xf32>
    %c0_26 = arith.constant 0 : index
    %c0_27 = arith.constant 0 : index
    %42 = vector.load %arg11[%c0_26, %c0_27] : memref<8x784xf32, #tpu.memory_space<vmem>>, vector<8x784xf32>
    tpu.vector_store %arg11[%c0_26, %c0_27], %41 {strides = array<i32>} : memref<8x784xf32, #tpu.memory_space<vmem>>, vector<8x784xf32>,
    %c0_28 = arith.constant 0 : index
    %c0_29 = arith.constant 0 : index
    %43 = vector.load %arg12[%c0_28, %c0_29] : memref<8x256xf32, #tpu.memory_space<vmem>>, vector<8x256xf32>
    tpu.vector_store %arg12[%c0_28, %c0_29], %14 {strides = array<i32>} : memref<8x256xf32, #tpu.memory_space<vmem>>, vector<8x256xf32>,
    return
  }
  func.func @transform_0(%arg0: i32) -> (i32, i32) {
    %c0_i32 = arith.constant 0 : i32
    %c0_i32_0 = arith.constant 0 : i32
    return %arg0, %c0_i32 : i32, i32
  }
  func.func @transform_1(%arg0: i32) -> (i32, i32) {
    %c0_i32 = arith.constant 0 : i32
    %c0_i32_0 = arith.constant 0 : i32
    %c0_i32_1 = arith.constant 0 : i32
    return %c0_i32, %c0_i32_0 : i32, i32
  }
  func.func @transform_2(%arg0: i32) -> (i32, i32) {
    %c0_i32 = arith.constant 0 : i32
    %c0_i32_0 = arith.constant 0 : i32
    %c0_i32_1 = arith.constant 0 : i32
    return %c0_i32, %c0_i32_0 : i32, i32
  }
  func.func @transform_3(%arg0: i32) -> (i32, i32) {
    %c0_i32 = arith.constant 0 : i32
    %c0_i32_0 = arith.constant 0 : i32
    %c0_i32_1 = arith.constant 0 : i32
    return %c0_i32, %c0_i32_0 : i32, i32
  }
  func.func @transform_4(%arg0: i32) -> (i32, i32) {
    %c0_i32 = arith.constant 0 : i32
    %c0_i32_0 = arith.constant 0 : i32
    %c0_i32_1 = arith.constant 0 : i32
    return %c0_i32, %c0_i32_0 : i32, i32
  }
  func.func @transform_5(%arg0: i32) -> (i32, i32) {
    %c0_i32 = arith.constant 0 : i32
    %c0_i32_0 = arith.constant 0 : i32
    %c0_i32_1 = arith.constant 0 : i32
    return %c0_i32, %c0_i32_0 : i32, i32
  }
  func.func @transform_6(%arg0: i32) -> (i32, i32) {
    %c0_i32 = arith.constant 0 : i32
    %c0_i32_0 = arith.constant 0 : i32
    %c0_i32_1 = arith.constant 0 : i32
    return %c0_i32, %c0_i32_0 : i32, i32
  }
  func.func @transform_7(%arg0: i32) -> (i32, i32) {
    %c0_i32 = arith.constant 0 : i32
    %c0_i32_0 = arith.constant 0 : i32
    %c0_i32_1 = arith.constant 0 : i32
    return %c0_i32, %c0_i32_0 : i32, i32
  }
  func.func @transform_8(%arg0: i32) -> (i32, i32) {
    %c0_i32 = arith.constant 0 : i32
    %c0_i32_0 = arith.constant 0 : i32
    %c0_i32_1 = arith.constant 0 : i32
    return %c0_i32, %c0_i32_0 : i32, i32
  }
  func.func @transform_9(%arg0: i32) -> (i32, i32) {
    %c0_i32 = arith.constant 0 : i32
    %c0_i32_0 = arith.constant 0 : i32
    return %arg0, %c0_i32 : i32, i32
  }
  func.func @transform_10(%arg0: i32) -> (i32, i32) {
    %c0_i32 = arith.constant 0 : i32
    %c0_i32_0 = arith.constant 0 : i32
    return %arg0, %c0_i32 : i32, i32
  }
  func.func @transform_11(%arg0: i32) -> (i32, i32) {
    %c0_i32 = arith.constant 0 : i32
    %c0_i32_0 = arith.constant 0 : i32
    return %arg0, %c0_i32 : i32, i32
  }
}

</mosaic_0001>

<bundles_post_ra>
// kernel: tpu_custom_call.1
= control target key start
LH: loop header
LB: loop body
LE: loop exit
PB: predicated region body
PF: predicated region fallthrough
CT: control target
= control target key end

     0   :  { %17 = vsyncpa [#allocation3], 0  ;;  %vm1252_vm0 = vcmask 130048   ;;  %s6707_s0 = inlined_call_operand.vmem [shape: f32[8,784], index: 0, kind: input, shape index: {}]   ;;  %s6708_s1 = inlined_call_operand.vmem [shape: bf16[784,400], index: 1, kind: input, shape index: {}]   ;;  %s6709_s2 = inlined_call_operand.vmem [shape: f32[1,400], index: 2, kind: input, shape index: {}]   ;;  %s6710_s3 = inlined_call_operand.vmem [shape: bf16[400,256], index: 3, kind: input, shape index: {}]   ;;  %s6711_s4 = inlined_call_operand.vmem [shape: f32[1,256], index: 4, kind: input, shape index: {}]   ;;  %s6712_s5 = inlined_call_operand.vmem [shape: bf16[128,400], index: 5, kind: input, shape index: {}]   ;;  %s6713_s6 = inlined_call_operand.vmem [shape: f32[1,400], index: 6, kind: input, shape index: {}]   ;;  %s6714_s7 = inlined_call_operand.vmem [shape: bf16[400,784], index: 7, kind: input, shape index: {}]   ;;  %s6715_s8 = inlined_call_operand.vmem [shape: f32[1,784], index: 8, kind: input, shape index: {}]   ;;  %s6716_s9 = inlined_call_operand.vmem [shape: f32[8,128], index: 9, kind: input, shape index: {}]   ;;  %s6717_s10 = inlined_call_operand.hbm [shape: f32[8,784], index: 10, kind: output, shape index: {0}]   ;;  %s6718_s11 = inlined_call_operand.hbm [shape: f32[8,256], index: 11, kind: output, shape index: {1}]  }
   0x1   :  { %v4389_v0 = vld [vmem:[%s6708_s1 + $0x4] ss:$16 sps:$4 sm:$0xff]   ;;  %v4391_v1 = vld [vmem:[%s6708_s1 + $0xc] ss:$16 sps:$4 sm:$0xff]   ;;  %v4393_v2 = vld [vmem:[%s6708_s1] ss:$16 sps:$4 sm:$0xff]  }
   0x2   :  { %1256 = vmatprep.subr.bf16.mxu0 %v4389_v0  ;;  %v4394_v3 = vld [vmem:[%s6708_s1 + $0x8] ss:$16 sps:$4 sm:$0xff]   ;;  %1420 = vmatprep.subr.bf16.mxu1 %v4391_v1  ;;  %v4395_v4 = vld [vmem:[%s6708_s1 + $0x24] ss:$16 sps:$4 sm:$0xff]   ;;  %v4397_v5 = vld [vmem:[%s6708_s1 + $0x2c] ss:$16 sps:$4 sm:$0xff]  }
   0x3   :  { %1257 = vmatpush1.bf16.msra.mxu0 %v4393_v2  ;;  %1421 = vmatpush1.bf16.msra.mxu1 %v4394_v3  ;;  %v4399_v6 = vld [vmem:[%s6708_s1 + $0x20] ss:$16 sps:$4 sm:$0xff]   ;;  %v4400_v7 = vld [vmem:[%s6708_s1 + $0x28] ss:$16 sps:$4 sm:$0xff]   ;;  %v4401_v8 = vld [vmem:[%s6708_s1 + $0x44] ss:$16 sps:$4 sm:$0xff]  }
   0x4   :  { %1258 = vmatprep.subr.bf16.mxu0 %v4395_v4  ;;  %1422 = vmatprep.subr.bf16.mxu1 %v4397_v5  ;;  %v4403_v9 = vld [vmem:[%s6708_s1 + $0x4c] ss:$16 sps:$4 sm:$0xff]   ;;  %v4405_v10 = vld [vmem:[%s6708_s1 + $0x40] ss:$16 sps:$4 sm:$0xff]   ;;  %v4406_v11 = vld [vmem:[%s6708_s1 + $0x48] ss:$16 sps:$4 sm:$0xff]  }
   0x5   :  { %v4407_v12 = vld [vmem:[%s6708_s1 + $0x64] ss:$16 sps:$4 sm:$0xff]   ;;  %v4409_v13 = vld [vmem:[%s6708_s1 + $0x6c] ss:$16 sps:$4 sm:$0xff]   ;;  %v4411_v14 = vld [vmem:[%s6708_s1 + $0x60] ss:$16 sps:$4 sm:$0xff]  }
   0x6   :  { %v4412_v15 = vld [vmem:[%s6708_s1 + $0x68] ss:$16 sps:$4 sm:$0xff]   ;;  %v4413_v16 = vld [vmem:[%s6708_s1 + $0x84] ss:$16 sps:$4 sm:$0xff]   ;;  %v4415_v17 = vld [vmem:[%s6708_s1 + $0x8c] ss:$16 sps:$4 sm:$0xff]  }
   0x7   :  { %1259 = vmatpush1.bf16.msra.mxu0 %v4399_v6  ;;  %1423 = vmatpush1.bf16.msra.mxu1 %v4400_v7  ;;  %v4417_v18 = vld [vmem:[%s6708_s1 + $0x80] ss:$16 sps:$4 sm:$0xff]   ;;  %v4418_v19 = vld [vmem:[%s6708_s1 + $0x88] ss:$16 sps:$4 sm:$0xff]   ;;  %v4419_v20 = vld [vmem:[%s6708_s1 + $0xa4] ss:$16 sps:$4 sm:$0xff]  }
   0x8   :  { %1260 = vmatprep.subr.bf16.mxu0 %v4401_v8  ;;  %1424 = vmatprep.subr.bf16.mxu1 %v4403_v9  ;;  %v4421_v21 = vld [vmem:[%s6708_s1 + $0xac] ss:$16 sps:$4 sm:$0xff]   ;;  %v4423_v22 = vld [vmem:[%s6708_s1 + $0xa0] ss:$16 sps:$4 sm:$0xff]   ;;  %v4424_v23 = vld [vmem:[%s6708_s1 + $0xa8] ss:$16 sps:$4 sm:$0xff]  }
   0x9   :  { %v4425_v24 = vld [vmem:[%s6708_s1 + $0xc4] ss:$16 sps:$4 sm:$0xff]   ;;  %v4427_v25 = vld [vmem:[%s6708_s1 + $0xcc] ss:$16 sps:$4 sm:$0xff]   ;;  %v4429_v26 = vld [vmem:[%s6708_s1 + $0xc0] ss:$16 sps:$4 sm:$0xff]  }
   0xa   :  { %v4430_v27 = vld [vmem:[%s6708_s1 + $0xc8] ss:$16 sps:$4 sm:$0xff]   ;;  %v4431_v28 = vld [vmem:[%s6708_s1 + $0xe4] ss:$16 sps:$4 sm:$0xff]   ;;  %v4433_v29 = vld [vmem:[%s6708_s1 + $0xec] ss:$16 sps:$4 sm:$0xff]  }
   0xb   :  { %1261 = vmatpush1.bf16.msra.mxu0 %v4405_v10  ;;  %1425 = vmatpush1.bf16.msra.mxu1 %v4406_v11  ;;  %v4435_v30 = vld [vmem:[%s6708_s1 + $0xe0] ss:$16 sps:$4 sm:$0xff]   ;;  %v4436_v31 = vld [vmem:[%s6708_s1 + $0xe8] ss:$16 sps:$4 sm:$0xff]   ;;  %v4437_v32 = vld [vmem:[%s6708_s1 + $0x104] ss:$16 sps:$4 sm:$0xff]  }
   0xc   :  { %1262 = vmatprep.subr.bf16.mxu0 %v4407_v12  ;;  %1426 = vmatprep.subr.bf16.mxu1 %v4409_v13  ;;  %v4439_v33 = vld [vmem:[%s6708_s1 + $0x10c] ss:$16 sps:$4 sm:$0xff]   ;;  %v4441_v34 = vld [vmem:[%s6708_s1 + $0x100] ss:$16 sps:$4 sm:$0xff]   ;;  %v4442_v35 = vld [vmem:[%s6708_s1 + $0x108] ss:$16 sps:$4 sm:$0xff]  }
   0xd   :  { %v4443_v36 = vld [vmem:[%s6708_s1 + $0x124] ss:$16 sps:$4 sm:$0xff]   ;;  %v4445_v37 = vld [vmem:[%s6708_s1 + $0x12c] ss:$16 sps:$4 sm:$0xff]   ;;  %v4447_v38 = vld [vmem:[%s6708_s1 + $0x120] ss:$16 sps:$4 sm:$0xff]  }
   0xe   :  { %v4448_v39 = vld [vmem:[%s6708_s1 + $0x128] ss:$16 sps:$4 sm:$0xff]   ;;  %v4449_v40 = vld [vmem:[%s6708_s1 + $0x144] ss:$16 sps:$4 sm:$0xff]   ;;  %v4451_v41 = vld [vmem:[%s6708_s1 + $0x14c] ss:$16 sps:$4 sm:$0xff]  }
   0xf   :  { %1263 = vmatpush1.bf16.msra.mxu0 %v4411_v14  ;;  %1427 = vmatpush1.bf16.msra.mxu1 %v4412_v15  ;;  %v4453_v42 = vld [vmem:[%s6708_s1 + $0x140] ss:$16 sps:$4 sm:$0xff]   ;;  %v4454_v43 = vld [vmem:[%s6708_s1 + $0x148] ss:$16 sps:$4 sm:$0xff]   ;;  %v4455_v44 = vld [vmem:[%s6708_s1 + $0x164] ss:$16 sps:$4 sm:$0xff]  }
  0x10   :  { %1264 = vmatprep.subr.bf16.mxu0 %v4413_v16  ;;  %1428 = vmatprep.subr.bf16.mxu1 %v4415_v17  ;;  %v4457_v45 = vld [vmem:[%s6708_s1 + $0x16c] ss:$16 sps:$4 sm:$0xff]   ;;  %v4459_v47 = vld [vmem:[%s6708_s1 + $0x160] ss:$16 sps:$4 sm:$0xff]   ;;  %v4460_v49 = vld [vmem:[%s6708_s1 + $0x168] ss:$16 sps:$4 sm:$0xff]  }
  0x11   :  { %v41_v46 = vld [vmem:[%s6707_s0 + $0x8] sm:$0xff]  ;;  %v4461_v50 = vld [vmem:[%s6708_s1 + $0x184] ss:$16 sps:$4 sm:$0xff]   ;;  %v4465_v52 = vld [vmem:[%s6708_s1 + $0x180] ss:$16 sps:$4 sm:$0xff]  }
  0x12   :  { %v48_v48 = vpack.c.bf16 %v41_v46, %v41_v46  ;;  %v4463_v51 = vld [vmem:[%s6708_s1 + $0x18c] ss:$16 sps:$4 sm:$0xff]   ;;  %v4466_v53 = vld [vmem:[%s6708_s1 + $0x188] ss:$16 sps:$4 sm:$0xff]   ;;  %v4467_v54 = vld [vmem:[%s6708_s1 + $0x1a4] ss:$16 sps:$4 sm:$0xff]  }
  0x13   :  { %1265 = vmatpush1.bf16.msra.mxu0 %v4417_v18  ;;  %1429 = vmatpush1.bf16.msra.mxu1 %v4418_v19  ;;  %v4469_v55 = vld [vmem:[%s6708_s1 + $0x1ac] ss:$16 sps:$4 sm:$0xff]   ;;  %v4471_v56 = vld [vmem:[%s6708_s1 + $0x1a0] ss:$16 sps:$4 sm:$0xff]   ;;  %v4472_v57 = vld [vmem:[%s6708_s1 + $0x1a8] ss:$16 sps:$4 sm:$0xff]  }
  0x14   :  { %1266 = vmatprep.subr.bf16.mxu0 %v4419_v20  ;;  %1430 = vmatprep.subr.bf16.mxu1 %v4421_v21  ;;  %v4473_v58 = vld [vmem:[%s6708_s1 + $0x1c4] ss:$16 sps:$4 sm:$0xff]   ;;  %v4475_v59 = vld [vmem:[%s6708_s1 + $0x1cc] ss:$16 sps:$4 sm:$0xff]   ;;  %v4477_v60 = vld [vmem:[%s6708_s1 + $0x1c0] ss:$16 sps:$4 sm:$0xff]  }
  0x15   :  { %1288 = vmatprep.mubr.bf16.mxu0 %v48_v48  ;;  %1452 = vmatprep.mubr.bf16.mxu1 %v48_v48  ;;  %v4478_v61 = vld [vmem:[%s6708_s1 + $0x1c8] ss:$16 sps:$4 sm:$0xff]   ;;  %v4479_v62 = vld [vmem:[%s6708_s1 + $0x1e4] ss:$16 sps:$4 sm:$0xff]   ;;  %v4481_v63 = vld [vmem:[%s6708_s1 + $0x1ec] ss:$16 sps:$4 sm:$0xff]  }
  0x16   :  { %v4483_v0 = vld [vmem:[%s6708_s1 + $0x1e0] ss:$16 sps:$4 sm:$0xff]   ;;  %v4484_v1 = vld [vmem:[%s6708_s1 + $0x1e8] ss:$16 sps:$4 sm:$0xff]   ;;  %v4487_v3 = vld [vmem:[%s6708_s1 + $0x204] ss:$16 sps:$4 sm:$0xff]  }
  0x17   :  { %1267 = vmatpush1.bf16.msra.mxu0 %v4423_v22  ;;  %1431 = vmatpush1.bf16.msra.mxu1 %v4424_v23  ;;  %v40_v2 = vld [vmem:[%s6707_s0] sm:$0xff]  ;;  %v4490_v4 = vld [vmem:[%s6708_s1 + $0x20c] ss:$16 sps:$4 sm:$0xff]   ;;  %v4488_v7 = vld [vmem:[%s6708_s1 + $0x208] ss:$16 sps:$4 sm:$0xff]  }
  0x18   :  { %1268 = vmatprep.subr.bf16.mxu0 %v4425_v24  ;;  %1432 = vmatprep.subr.bf16.mxu1 %v4427_v25  ;;  %v47_v5 = vpack.c.bf16 %v40_v2, %v40_v2  ;;  %v4485_v6 = vld [vmem:[%s6708_s1 + $0x200] ss:$16 sps:$4 sm:$0xff]   ;;  %v4493_v8 = vld [vmem:[%s6708_s1 + $0x224] ss:$16 sps:$4 sm:$0xff]   ;;  %v4496_v9 = vld [vmem:[%s6708_s1 + $0x22c] ss:$16 sps:$4 sm:$0xff]  }
  0x19   :  { %v4491_v10 = vld [vmem:[%s6708_s1 + $0x220] ss:$16 sps:$4 sm:$0xff]   ;;  %v4494_v11 = vld [vmem:[%s6708_s1 + $0x228] ss:$16 sps:$4 sm:$0xff]   ;;  %v4499_v12 = vld [vmem:[%s6708_s1 + $0x244] ss:$16 sps:$4 sm:$0xff]  }
  0x1a   :  { %v4502_v13 = vld [vmem:[%s6708_s1 + $0x24c] ss:$16 sps:$4 sm:$0xff]   ;;  %v4497_v14 = vld [vmem:[%s6708_s1 + $0x240] ss:$16 sps:$4 sm:$0xff]   ;;  %v4500_v15 = vld [vmem:[%s6708_s1 + $0x248] ss:$16 sps:$4 sm:$0xff]  }
  0x1b   :  { %1269 = vmatpush1.bf16.msra.mxu0 %v4429_v26  ;;  %1433 = vmatpush1.bf16.msra.mxu1 %v4430_v27  ;;  %v4505_v16 = vld [vmem:[%s6708_s1 + $0x264] ss:$16 sps:$4 sm:$0xff]   ;;  %v4508_v17 = vld [vmem:[%s6708_s1 + $0x26c] ss:$16 sps:$4 sm:$0xff]   ;;  %v4503_v18 = vld [vmem:[%s6708_s1 + $0x260] ss:$16 sps:$4 sm:$0xff]  }
  0x1c   :  { %1270 = vmatprep.subr.bf16.mxu0 %v4431_v28  ;;  %1434 = vmatprep.subr.bf16.mxu1 %v4433_v29  ;;  %v4506_v19 = vld [vmem:[%s6708_s1 + $0x268] ss:$16 sps:$4 sm:$0xff]   ;;  %v4511_v20 = vld [vmem:[%s6708_s1 + $0x284] ss:$16 sps:$4 sm:$0xff]   ;;  %v4514_v21 = vld [vmem:[%s6708_s1 + $0x28c] ss:$16 sps:$4 sm:$0xff]  }
  0x1d   :  { %v4509_v22 = vld [vmem:[%s6708_s1 + $0x280] ss:$16 sps:$4 sm:$0xff]   ;;  %v4512_v23 = vld [vmem:[%s6708_s1 + $0x288] ss:$16 sps:$4 sm:$0xff]   ;;  %v4517_v24 = vld [vmem:[%s6708_s1 + $0x2a4] ss:$16 sps:$4 sm:$0xff]  }
  0x1e   :  { %v4520_v25 = vld [vmem:[%s6708_s1 + $0x2ac] ss:$16 sps:$4 sm:$0xff]   ;;  %v4515_v26 = vld [vmem:[%s6708_s1 + $0x2a0] ss:$16 sps:$4 sm:$0xff]   ;;  %v4518_v27 = vld [vmem:[%s6708_s1 + $0x2a8] ss:$16 sps:$4 sm:$0xff]  }
  0x1f   :  { %1271 = vmatpush1.bf16.msra.mxu0 %v4435_v30  ;;  %1435 = vmatpush1.bf16.msra.mxu1 %v4436_v31  ;;  %v4523_v28 = vld [vmem:[%s6708_s1 + $0x2c4] ss:$16 sps:$4 sm:$0xff]   ;;  %v4526_v29 = vld [vmem:[%s6708_s1 + $0x2cc] ss:$16 sps:$4 sm:$0xff]   ;;  %v4521_v31 = vld [vmem:[%s6708_s1 + $0x2c0] ss:$16 sps:$4 sm:$0xff]  }
  0x20   :  { %1272 = vmatprep.subr.bf16.mxu0 %v4437_v32  ;;  %1436 = vmatprep.subr.bf16.mxu1 %v4439_v33  ;;  %v43_v30 = vld [vmem:[%s6707_s0 + $0x18] sm:$0xff]  ;;  %v4547_v46 = vld [vmem:[%s6708_s1 + $0x344] ss:$16 sps:$4 sm:$0xff]   ;;  %v4545_v48 = vld [vmem:[%s6708_s1 + $0x340] ss:$16 sps:$4 sm:$0xff]  }
  0x21   :  { %v50_v32 = vpack.c.bf16 %v43_v30, %v43_v30  ;;  %v4524_v33 = vld [vmem:[%s6708_s1 + $0x2c8] ss:$16 sps:$4 sm:$0xff]   ;;  %v4577_v2 = vld [vmem:[%s6708_s1 + $0x3e4] ss:$16 sps:$4 sm:$0xff]  }
  0x22   :  { %v4613_v30 = vld [vmem:[%s6708_s1 + $0x4a4] ss:$16 sps:$4 sm:$0xff]  }
  0x23   :  { %1273 = vmatpush1.bf16.msra.mxu0 %v4441_v34  ;;  %1437 = vmatpush1.bf16.msra.mxu1 %v4442_v35  ;;  %v4529_v34 = vld [vmem:[%s6708_s1 + $0x2e4] ss:$16 sps:$4 sm:$0xff]   ;;  %v4532_v35 = vld [vmem:[%s6708_s1 + $0x2ec] ss:$16 sps:$4 sm:$0xff]  }
  0x24   :  { %1274 = vmatprep.subr.bf16.mxu0 %v4443_v36  ;;  %1438 = vmatprep.subr.bf16.mxu1 %v4445_v37  ;;  %v4527_v36 = vld [vmem:[%s6708_s1 + $0x2e0] ss:$16 sps:$4 sm:$0xff]   ;;  %v4530_v37 = vld [vmem:[%s6708_s1 + $0x2e8] ss:$16 sps:$4 sm:$0xff]  }
  0x27   :  { %1275 = vmatpush1.bf16.msra.mxu0 %v4447_v38  ;;  %1439 = vmatpush1.bf16.msra.mxu1 %v4448_v39  ;;  %v4535_v38 = vld [vmem:[%s6708_s1 + $0x304] ss:$16 sps:$4 sm:$0xff]   ;;  %v4538_v39 = vld [vmem:[%s6708_s1 + $0x30c] ss:$16 sps:$4 sm:$0xff]  }
  0x28   :  { %1276 = vmatprep.subr.bf16.mxu0 %v4449_v40  ;;  %1440 = vmatprep.subr.bf16.mxu1 %v4451_v41  ;;  %v4533_v40 = vld [vmem:[%s6708_s1 + $0x300] ss:$16 sps:$4 sm:$0xff]   ;;  %v4536_v41 = vld [vmem:[%s6708_s1 + $0x308] ss:$16 sps:$4 sm:$0xff]  }
  0x2b   :  { %1277 = vmatpush1.bf16.msra.mxu0 %v4453_v42  ;;  %1441 = vmatpush1.bf16.msra.mxu1 %v4454_v43  ;;  %v4541_v42 = vld [vmem:[%s6708_s1 + $0x324] ss:$16 sps:$4 sm:$0xff]   ;;  %v4544_v43 = vld [vmem:[%s6708_s1 + $0x32c] ss:$16 sps:$4 sm:$0xff]  }
  0x2c   :  { %1278 = vmatprep.subr.bf16.mxu0 %v4455_v44  ;;  %1442 = vmatprep.subr.bf16.mxu1 %v4457_v45  ;;  %v4539_v44 = vld [vmem:[%s6708_s1 + $0x320] ss:$16 sps:$4 sm:$0xff]   ;;  %v4542_v45 = vld [vmem:[%s6708_s1 + $0x328] ss:$16 sps:$4 sm:$0xff]  }
  0x2f   :  { %1279 = vmatpush1.bf16.msra.mxu0 %v4459_v47  ;;  %1443 = vmatpush1.bf16.msra.mxu1 %v4460_v49  ;;  %v4550_v47 = vld [vmem:[%s6708_s1 + $0x34c] ss:$16 sps:$4 sm:$0xff]   ;;  %v4548_v49 = vld [vmem:[%s6708_s1 + $0x348] ss:$16 sps:$4 sm:$0xff]  }
  0x30   :  { %1280 = vmatprep.subr.bf16.mxu0 %v4461_v50  ;;  %1444 = vmatprep.subr.bf16.mxu1 %v4463_v51  ;;  %v4553_v50 = vld [vmem:[%s6708_s1 + $0x364] ss:$16 sps:$4 sm:$0xff]   ;;  %v4556_v51 = vld [vmem:[%s6708_s1 + $0x36c] ss:$16 sps:$4 sm:$0xff]  }
  0x33   :  { %1281 = vmatpush1.bf16.msra.mxu0 %v4465_v52  ;;  %1445 = vmatpush1.bf16.msra.mxu1 %v4466_v53  ;;  %v4551_v52 = vld [vmem:[%s6708_s1 + $0x360] ss:$16 sps:$4 sm:$0xff]   ;;  %v4554_v53 = vld [vmem:[%s6708_s1 + $0x368] ss:$16 sps:$4 sm:$0xff]  }
  0x34   :  { %1282 = vmatprep.subr.bf16.mxu0 %v4467_v54  ;;  %1446 = vmatprep.subr.bf16.mxu1 %v4469_v55  ;;  %v4559_v54 = vld [vmem:[%s6708_s1 + $0x384] ss:$16 sps:$4 sm:$0xff]   ;;  %v4562_v55 = vld [vmem:[%s6708_s1 + $0x38c] ss:$16 sps:$4 sm:$0xff]  }
  0x37   :  { %1283 = vmatpush1.bf16.msra.mxu0 %v4471_v56  ;;  %1447 = vmatpush1.bf16.msra.mxu1 %v4472_v57  ;;  %v4557_v56 = vld [vmem:[%s6708_s1 + $0x380] ss:$16 sps:$4 sm:$0xff]   ;;  %v4560_v57 = vld [vmem:[%s6708_s1 + $0x388] ss:$16 sps:$4 sm:$0xff]  }
  0x38   :  { %1284 = vmatprep.subr.bf16.mxu0 %v4473_v58  ;;  %1448 = vmatprep.subr.bf16.mxu1 %v4475_v59  ;;  %v4565_v58 = vld [vmem:[%s6708_s1 + $0x3a4] ss:$16 sps:$4 sm:$0xff]   ;;  %v4568_v59 = vld [vmem:[%s6708_s1 + $0x3ac] ss:$16 sps:$4 sm:$0xff]  }
  0x3b   :  { %1285 = vmatpush1.bf16.msra.mxu0 %v4477_v60  ;;  %1449 = vmatpush1.bf16.msra.mxu1 %v4478_v61  ;;  %v4563_v60 = vld [vmem:[%s6708_s1 + $0x3a0] ss:$16 sps:$4 sm:$0xff]   ;;  %v4566_v61 = vld [vmem:[%s6708_s1 + $0x3a8] ss:$16 sps:$4 sm:$0xff]  }
  0x3c   :  { %1286 = vmatprep.subr.bf16.mxu0 %v4479_v62  ;;  %1450 = vmatprep.subr.bf16.mxu1 %v4481_v63  ;;  %v4571_v62 = vld [vmem:[%s6708_s1 + $0x3c4] ss:$16 sps:$4 sm:$0xff]   ;;  %v4574_v63 = vld [vmem:[%s6708_s1 + $0x3cc] ss:$16 sps:$4 sm:$0xff]  }
  0x3f   :  { %1287 = vmatpush1.bf16.msra.mxu0 %v4483_v0  ;;  %1451 = vmatpush1.bf16.msra.mxu1 %v4484_v1  ;;  %v4569_v0 = vld [vmem:[%s6708_s1 + $0x3c0] ss:$16 sps:$4 sm:$0xff]   ;;  %v4572_v1 = vld [vmem:[%s6708_s1 + $0x3c8] ss:$16 sps:$4 sm:$0xff]  }
  0x40   :  { %1297 = vmatprep.subr.bf16.mxu0 %v4487_v3  ;;  %1461 = vmatprep.subr.bf16.mxu1 %v4490_v4  ;;  %v4580_v3 = vld [vmem:[%s6708_s1 + $0x3ec] ss:$16 sps:$4 sm:$0xff]   ;;  %v4575_v4 = vld [vmem:[%s6708_s1 + $0x3e0] ss:$16 sps:$4 sm:$0xff]  }
  0x42   :  { %1289 = vmatmul.mubr.bf16.vlgmr.msra.gmra.mrb[0].mxu0 %v47_v5  ;;  %1453 = vmatmul.mubr.bf16.vlgmr.msra.gmra.mrb[0].mxu1 %v47_v5  ;;  %v4578_v5 = vld [vmem:[%s6708_s1 + $0x3e8] ss:$16 sps:$4 sm:$0xff]  }
  0x43   :  { %1298 = vmatpush1.bf16.msra.mxu0 %v4485_v6  ;;  %1462 = vmatpush1.bf16.msra.mxu1 %v4488_v7  ;;  %v4583_v6 = vld [vmem:[%s6708_s1 + $0x404] ss:$16 sps:$4 sm:$0xff]  }
  0x44   :  { %1299 = vmatprep.subr.bf16.mxu0 %v4493_v8  ;;  %1463 = vmatprep.subr.bf16.mxu1 %v4496_v9  ;;  %v42_v7 = vld [vmem:[%s6707_s0 + $0x10] sm:$0xff]  ;;  %v4586_v8 = vld [vmem:[%s6708_s1 + $0x40c] ss:$16 sps:$4 sm:$0xff]  }
  0x45   :  { %1329 = vmatprep.mubr.bf16.mxu0 %v50_v32  ;;  %1493 = vmatprep.mubr.bf16.mxu1 %v50_v32  ;;  %v4581_v9 = vld [vmem:[%s6708_s1 + $0x400] ss:$16 sps:$4 sm:$0xff]  }
  0x46   :  { %v4611_v32 = vld [vmem:[%s6708_s1 + $0x4a0] ss:$16 sps:$4 sm:$0xff]  }
  0x47   :  { %1300 = vmatpush1.bf16.msra.mxu0 %v4491_v10  ;;  %1464 = vmatpush1.bf16.msra.mxu1 %v4494_v11  ;;  %v49_v10 = vpack.c.bf16 %v42_v7, %v42_v7  ;;  %v4584_v11 = vld [vmem:[%s6708_s1 + $0x408] ss:$16 sps:$4 sm:$0xff]   ;;  %v4676_v7 = vld [vmem:[%s6708_s1 + $0x5ec] ss:$16 sps:$4 sm:$0xff]  }
  0x48   :  { %1301 = vmatprep.subr.bf16.mxu0 %v4499_v12  ;;  %1465 = vmatprep.subr.bf16.mxu1 %v4502_v13  ;;  %v4589_v12 = vld [vmem:[%s6708_s1 + $0x424] ss:$16 sps:$4 sm:$0xff]   ;;  %v4592_v13 = vld [vmem:[%s6708_s1 + $0x42c] ss:$16 sps:$4 sm:$0xff]  }
  0x4b   :  { %1302 = vmatpush1.bf16.msra.mxu0 %v4497_v14  ;;  %1466 = vmatpush1.bf16.msra.mxu1 %v4500_v15  ;;  %v45_v14 = vld [vmem:[%s6707_s0 + $0x28] sm:$0xff] }
  0x4c   :  { %1303 = vmatprep.subr.bf16.mxu0 %v4505_v16  ;;  %1467 = vmatprep.subr.bf16.mxu1 %v4508_v17  ;;  %v52_v15 = vpack.c.bf16 %v45_v14, %v45_v14  ;;  %v4587_v16 = vld [vmem:[%s6708_s1 + $0x420] ss:$16 sps:$4 sm:$0xff]   ;;  %v4590_v17 = vld [vmem:[%s6708_s1 + $0x428] ss:$16 sps:$4 sm:$0xff]  }
  0x4d   :  { %v4680_v14 = vld [vmem:[%s6708_s1 + $0x608] ss:$16 sps:$4 sm:$0xff]  }
  0x4f   :  { %1304 = vmatpush1.bf16.msra.mxu0 %v4503_v18  ;;  %1468 = vmatpush1.bf16.msra.mxu1 %v4506_v19  ;;  %v4595_v18 = vld [vmem:[%s6708_s1 + $0x444] ss:$16 sps:$4 sm:$0xff]   ;;  %v4598_v19 = vld [vmem:[%s6708_s1 + $0x44c] ss:$16 sps:$4 sm:$0xff]  }
  0x50   :  { %1305 = vmatprep.subr.bf16.mxu0 %v4511_v20  ;;  %1469 = vmatprep.subr.bf16.mxu1 %v4514_v21  ;;  %v4593_v20 = vld [vmem:[%s6708_s1 + $0x440] ss:$16 sps:$4 sm:$0xff]   ;;  %v4596_v21 = vld [vmem:[%s6708_s1 + $0x448] ss:$16 sps:$4 sm:$0xff]  }
  0x53   :  { %1306 = vmatpush1.bf16.msra.mxu0 %v4509_v22  ;;  %1470 = vmatpush1.bf16.msra.mxu1 %v4512_v23  ;;  %v4601_v22 = vld [vmem:[%s6708_s1 + $0x464] ss:$16 sps:$4 sm:$0xff]   ;;  %v4604_v23 = vld [vmem:[%s6708_s1 + $0x46c] ss:$16 sps:$4 sm:$0xff]  }
  0x54   :  { %1307 = vmatprep.subr.bf16.mxu0 %v4517_v24  ;;  %1471 = vmatprep.subr.bf16.mxu1 %v4520_v25  ;;  %v4599_v24 = vld [vmem:[%s6708_s1 + $0x460] ss:$16 sps:$4 sm:$0xff]   ;;  %v4602_v25 = vld [vmem:[%s6708_s1 + $0x468] ss:$16 sps:$4 sm:$0xff]  }
  0x57   :  { %1308 = vmatpush1.bf16.msra.mxu0 %v4515_v26  ;;  %1472 = vmatpush1.bf16.msra.mxu1 %v4518_v27  ;;  %v4607_v26 = vld [vmem:[%s6708_s1 + $0x484] ss:$16 sps:$4 sm:$0xff]   ;;  %v4610_v27 = vld [vmem:[%s6708_s1 + $0x48c] ss:$16 sps:$4 sm:$0xff]  }
  0x58   :  { %1309 = vmatprep.subr.bf16.mxu0 %v4523_v28  ;;  %1473 = vmatprep.subr.bf16.mxu1 %v4526_v29  ;;  %v4605_v28 = vld [vmem:[%s6708_s1 + $0x480] ss:$16 sps:$4 sm:$0xff]   ;;  %v4608_v29 = vld [vmem:[%s6708_s1 + $0x488] ss:$16 sps:$4 sm:$0xff]  }
  0x5b   :  { %1310 = vmatpush1.bf16.msra.mxu0 %v4521_v31  ;;  %1474 = vmatpush1.bf16.msra.mxu1 %v4524_v33  ;;  %v4616_v31 = vld [vmem:[%s6708_s1 + $0x4ac] ss:$16 sps:$4 sm:$0xff]   ;;  %v4614_v33 = vld [vmem:[%s6708_s1 + $0x4a8] ss:$16 sps:$4 sm:$0xff]  }
  0x5c   :  { %1311 = vmatprep.subr.bf16.mxu0 %v4529_v34  ;;  %1475 = vmatprep.subr.bf16.mxu1 %v4532_v35  ;;  %v4619_v34 = vld [vmem:[%s6708_s1 + $0x4c4] ss:$16 sps:$4 sm:$0xff]   ;;  %v4622_v35 = vld [vmem:[%s6708_s1 + $0x4cc] ss:$16 sps:$4 sm:$0xff]  }
  0x5f   :  { %1312 = vmatpush1.bf16.msra.mxu0 %v4527_v36  ;;  %1476 = vmatpush1.bf16.msra.mxu1 %v4530_v37  ;;  %v4617_v36 = vld [vmem:[%s6708_s1 + $0x4c0] ss:$16 sps:$4 sm:$0xff]   ;;  %v4620_v37 = vld [vmem:[%s6708_s1 + $0x4c8] ss:$16 sps:$4 sm:$0xff]  }
  0x60   :  { %1313 = vmatprep.subr.bf16.mxu0 %v4535_v38  ;;  %1477 = vmatprep.subr.bf16.mxu1 %v4538_v39  ;;  %v4625_v38 = vld [vmem:[%s6708_s1 + $0x4e4] ss:$16 sps:$4 sm:$0xff]   ;;  %v4628_v39 = vld [vmem:[%s6708_s1 + $0x4ec] ss:$16 sps:$4 sm:$0xff]  }
  0x63   :  { %1314 = vmatpush1.bf16.msra.mxu0 %v4533_v40  ;;  %1478 = vmatpush1.bf16.msra.mxu1 %v4536_v41  ;;  %v4623_v40 = vld [vmem:[%s6708_s1 + $0x4e0] ss:$16 sps:$4 sm:$0xff]   ;;  %v4626_v41 = vld [vmem:[%s6708_s1 + $0x4e8] ss:$16 sps:$4 sm:$0xff]  }
  0x64   :  { %1315 = vmatprep.subr.bf16.mxu0 %v4541_v42  ;;  %1479 = vmatprep.subr.bf16.mxu1 %v4544_v43  ;;  %v4631_v42 = vld [vmem:[%s6708_s1 + $0x504] ss:$16 sps:$4 sm:$0xff]   ;;  %v4634_v43 = vld [vmem:[%s6708_s1 + $0x50c] ss:$16 sps:$4 sm:$0xff]  }
  0x67   :  { %1316 = vmatpush1.bf16.msra.mxu0 %v4539_v44  ;;  %1480 = vmatpush1.bf16.msra.mxu1 %v4542_v45  ;;  %v4629_v44 = vld [vmem:[%s6708_s1 + $0x500] ss:$16 sps:$4 sm:$0xff]   ;;  %v4632_v45 = vld [vmem:[%s6708_s1 + $0x508] ss:$16 sps:$4 sm:$0xff]  }
  0x68   :  { %1317 = vmatprep.subr.bf16.mxu0 %v4547_v46  ;;  %1481 = vmatprep.subr.bf16.mxu1 %v4550_v47  ;;  %v4637_v46 = vld [vmem:[%s6708_s1 + $0x524] ss:$16 sps:$4 sm:$0xff]   ;;  %v4640_v47 = vld [vmem:[%s6708_s1 + $0x52c] ss:$16 sps:$4 sm:$0xff]  }
  0x6b   :  { %1318 = vmatpush1.bf16.msra.mxu0 %v4545_v48  ;;  %1482 = vmatpush1.bf16.msra.mxu1 %v4548_v49  ;;  %v4635_v48 = vld [vmem:[%s6708_s1 + $0x520] ss:$16 sps:$4 sm:$0xff]   ;;  %v4638_v49 = vld [vmem:[%s6708_s1 + $0x528] ss:$16 sps:$4 sm:$0xff]  }
  0x6c   :  { %1319 = vmatprep.subr.bf16.mxu0 %v4553_v50  ;;  %1483 = vmatprep.subr.bf16.mxu1 %v4556_v51  ;;  %v4643_v50 = vld [vmem:[%s6708_s1 + $0x544] ss:$16 sps:$4 sm:$0xff]   ;;  %v4646_v51 = vld [vmem:[%s6708_s1 + $0x54c] ss:$16 sps:$4 sm:$0xff]  }
  0x6f   :  { %1320 = vmatpush1.bf16.msra.mxu0 %v4551_v52  ;;  %1484 = vmatpush1.bf16.msra.mxu1 %v4554_v53  ;;  %v4641_v52 = vld [vmem:[%s6708_s1 + $0x540] ss:$16 sps:$4 sm:$0xff]   ;;  %v4644_v53 = vld [vmem:[%s6708_s1 + $0x548] ss:$16 sps:$4 sm:$0xff]  }
  0x70   :  { %1321 = vmatprep.subr.bf16.mxu0 %v4559_v54  ;;  %1485 = vmatprep.subr.bf16.mxu1 %v4562_v55  ;;  %v4649_v54 = vld [vmem:[%s6708_s1 + $0x564] ss:$16 sps:$4 sm:$0xff]   ;;  %v4652_v55 = vld [vmem:[%s6708_s1 + $0x56c] ss:$16 sps:$4 sm:$0xff]  }
  0x73   :  { %1322 = vmatpush1.bf16.msra.mxu0 %v4557_v56  ;;  %1486 = vmatpush1.bf16.msra.mxu1 %v4560_v57  ;;  %v4647_v56 = vld [vmem:[%s6708_s1 + $0x560] ss:$16 sps:$4 sm:$0xff]   ;;  %v4650_v57 = vld [vmem:[%s6708_s1 + $0x568] ss:$16 sps:$4 sm:$0xff]  }
  0x74   :  { %1323 = vmatprep.subr.bf16.mxu0 %v4565_v58  ;;  %1487 = vmatprep.subr.bf16.mxu1 %v4568_v59  ;;  %v4655_v58 = vld [vmem:[%s6708_s1 + $0x584] ss:$16 sps:$4 sm:$0xff]   ;;  %v4658_v59 = vld [vmem:[%s6708_s1 + $0x58c] ss:$16 sps:$4 sm:$0xff]  }
  0x77   :  { %1324 = vmatpush1.bf16.msra.mxu0 %v4563_v60  ;;  %1488 = vmatpush1.bf16.msra.mxu1 %v4566_v61  ;;  %v4653_v60 = vld [vmem:[%s6708_s1 + $0x580] ss:$16 sps:$4 sm:$0xff]   ;;  %v4656_v61 = vld [vmem:[%s6708_s1 + $0x588] ss:$16 sps:$4 sm:$0xff]  }
  0x78   :  { %1325 = vmatprep.subr.bf16.mxu0 %v4571_v62  ;;  %1489 = vmatprep.subr.bf16.mxu1 %v4574_v63  ;;  %v4661_v62 = vld [vmem:[%s6708_s1 + $0x5a4] ss:$16 sps:$4 sm:$0xff]   ;;  %v4664_v63 = vld [vmem:[%s6708_s1 + $0x5ac] ss:$16 sps:$4 sm:$0xff]  }
  0x7b   :  { %1326 = vmatpush1.bf16.msra.mxu0 %v4569_v0  ;;  %1490 = vmatpush1.bf16.msra.mxu1 %v4572_v1  ;;  %v4659_v0 = vld [vmem:[%s6708_s1 + $0x5a0] ss:$16 sps:$4 sm:$0xff]   ;;  %v4662_v1 = vld [vmem:[%s6708_s1 + $0x5a8] ss:$16 sps:$4 sm:$0xff]  }
  0x7c   :  { %1327 = vmatprep.subr.bf16.mxu0 %v4577_v2  ;;  %1491 = vmatprep.subr.bf16.mxu1 %v4580_v3  ;;  %v4667_v2 = vld [vmem:[%s6708_s1 + $0x5c4] ss:$16 sps:$4 sm:$0xff]   ;;  %v4670_v3 = vld [vmem:[%s6708_s1 + $0x5cc] ss:$16 sps:$4 sm:$0xff]  }
  0x7f   :  { %1328 = vmatpush1.bf16.msra.mxu0 %v4575_v4  ;;  %1492 = vmatpush1.bf16.msra.mxu1 %v4578_v5  ;;  %v4665_v4 = vld [vmem:[%s6708_s1 + $0x5c0] ss:$16 sps:$4 sm:$0xff]   ;;  %v4668_v5 = vld [vmem:[%s6708_s1 + $0x5c8] ss:$16 sps:$4 sm:$0xff]  }
  0x80   :  { %1338 = vmatprep.subr.bf16.mxu0 %v4583_v6  ;;  %1502 = vmatprep.subr.bf16.mxu1 %v4586_v8  ;;  %v4673_v6 = vld [vmem:[%s6708_s1 + $0x5e4] ss:$16 sps:$4 sm:$0xff]   ;;  %v4671_v8 = vld [vmem:[%s6708_s1 + $0x5e0] ss:$16 sps:$4 sm:$0xff]  }
  0x82   :  { %1330 = vmatmul.mubr.bf16.vlgmr.msra.gmra.mrb[0].mxu0 %v49_v10  ;;  %1494 = vmatmul.mubr.bf16.vlgmr.msra.gmra.mrb[0].mxu1 %v49_v10  ;;  %v44_v10 = vld [vmem:[%s6707_s0 + $0x20] sm:$0xff] }
  0x83   :  { %1339 = vmatpush1.bf16.msra.mxu0 %v4581_v9  ;;  %1503 = vmatpush1.bf16.msra.mxu1 %v4584_v11  ;;  %v4674_v9 = vld [vmem:[%s6708_s1 + $0x5e8] ss:$16 sps:$4 sm:$0xff]   ;;  %v4679_v11 = vld [vmem:[%s6708_s1 + $0x604] ss:$16 sps:$4 sm:$0xff]  }
  0x84   :  { %1340 = vmatprep.subr.bf16.mxu0 %v4589_v12  ;;  %1504 = vmatprep.subr.bf16.mxu1 %v4592_v13  ;;  %v4682_v12 = vld [vmem:[%s6708_s1 + $0x60c] ss:$16 sps:$4 sm:$0xff]   ;;  %v4677_v13 = vld [vmem:[%s6708_s1 + $0x600] ss:$16 sps:$4 sm:$0xff]  }
  0x85   :  { %1370 = vmatprep.mubr.bf16.mxu0 %v52_v15  ;;  %1534 = vmatprep.mubr.bf16.mxu1 %v52_v15  ;;  %v51_v15 = vpack.c.bf16 %v44_v10, %v44_v10 }
  0x87   :  { %1341 = vmatpush1.bf16.msra.mxu0 %v4587_v16  ;;  %1505 = vmatpush1.bf16.msra.mxu1 %v4590_v17  ;;  %v4685_v16 = vld [vmem:[%s6710_s3 + $0x4] ss:$8 sps:$4 sm:$0xff]   ;;  %v5134_v17 = vmov 0  }
  0x88   :  { %1342 = vmatprep.subr.bf16.mxu0 %v4595_v18  ;;  %1506 = vmatprep.subr.bf16.mxu1 %v4598_v19  ;;  %v46_v18 = vld [vmem:[%s6707_s0 + $0x30] sm:$0xff]  ;;  %v4683_v19 = vld [vmem:[%s6710_s3] ss:$8 sps:$4 sm:$0xff]  }
  0x8b   :  { %1343 = vmatpush1.bf16.msra.mxu0 %v4593_v20  ;;  %1507 = vmatpush1.bf16.msra.mxu1 %v4596_v21  ;;  %v53_v20 = vpack.c.bf16 %v46_v18, %v46_v18  ;;  %v4688_v21 = vld [vmem:[%s6710_s3 + $0x14] ss:$8 sps:$4 sm:$0xff]  }
  0x8c   :  { %1344 = vmatprep.subr.bf16.mxu0 %v4601_v22  ;;  %1508 = vmatprep.subr.bf16.mxu1 %v4604_v23  ;;  %v4686_v22 = vld [vmem:[%s6710_s3 + $0x10] ss:$8 sps:$4 sm:$0xff]   ;;  %v4691_v23 = vld [vmem:[%s6710_s3 + $0x24] ss:$8 sps:$4 sm:$0xff]  }
  0x8f   :  { %1345 = vmatpush1.bf16.msra.mxu0 %v4599_v24  ;;  %1509 = vmatpush1.bf16.msra.mxu1 %v4602_v25  ;;  %v4689_v24 = vld [vmem:[%s6710_s3 + $0x20] ss:$8 sps:$4 sm:$0xff]   ;;  %v4694_v25 = vld [vmem:[%s6710_s3 + $0x34] ss:$8 sps:$4 sm:$0xff]  }
  0x90   :  { %1346 = vmatprep.subr.bf16.mxu0 %v4607_v26  ;;  %1510 = vmatprep.subr.bf16.mxu1 %v4610_v27  ;;  %v4692_v26 = vld [vmem:[%s6710_s3 + $0x30] ss:$8 sps:$4 sm:$0xff]   ;;  %v4697_v27 = vld [vmem:[%s6710_s3 + $0x44] ss:$8 sps:$4 sm:$0xff]  }
  0x93   :  { %1347 = vmatpush1.bf16.msra.mxu0 %v4605_v28  ;;  %1511 = vmatpush1.bf16.msra.mxu1 %v4608_v29  ;;  %v4695_v28 = vld [vmem:[%s6710_s3 + $0x40] ss:$8 sps:$4 sm:$0xff]   ;;  %v4700_v29 = vld [vmem:[%s6710_s3 + $0x54] ss:$8 sps:$4 sm:$0xff]  }
  0x94   :  { %1348 = vmatprep.subr.bf16.mxu0 %v4613_v30  ;;  %1512 = vmatprep.subr.bf16.mxu1 %v4616_v31  ;;  %v4698_v30 = vld [vmem:[%s6710_s3 + $0x50] ss:$8 sps:$4 sm:$0xff]   ;;  %v4703_v31 = vld [vmem:[%s6710_s3 + $0x64] ss:$8 sps:$4 sm:$0xff]  }
  0x97   :  { %1349 = vmatpush1.bf16.msra.mxu0 %v4611_v32  ;;  %1513 = vmatpush1.bf16.msra.mxu1 %v4614_v33  ;;  %v4701_v32 = vld [vmem:[%s6710_s3 + $0x60] ss:$8 sps:$4 sm:$0xff]   ;;  %v4706_v33 = vld [vmem:[%s6710_s3 + $0x74] ss:$8 sps:$4 sm:$0xff]  }
  0x98   :  { %1350 = vmatprep.subr.bf16.mxu0 %v4619_v34  ;;  %1514 = vmatprep.subr.bf16.mxu1 %v4622_v35  ;;  %v4704_v34 = vld [vmem:[%s6710_s3 + $0x70] ss:$8 sps:$4 sm:$0xff]   ;;  %v4709_v35 = vld [vmem:[%s6710_s3 + $0x84] ss:$8 sps:$4 sm:$0xff]  }
  0x9b   :  { %1351 = vmatpush1.bf16.msra.mxu0 %v4617_v36  ;;  %1515 = vmatpush1.bf16.msra.mxu1 %v4620_v37  ;;  %v4707_v36 = vld [vmem:[%s6710_s3 + $0x80] ss:$8 sps:$4 sm:$0xff]  }
  0x9c   :  { %1352 = vmatprep.subr.bf16.mxu0 %v4625_v38  ;;  %1516 = vmatprep.subr.bf16.mxu1 %v4628_v39 }
  0x9f   :  { %1353 = vmatpush1.bf16.msra.mxu0 %v4623_v40  ;;  %1517 = vmatpush1.bf16.msra.mxu1 %v4626_v41 }
  0xa0   :  { %1354 = vmatprep.subr.bf16.mxu0 %v4631_v42  ;;  %1518 = vmatprep.subr.bf16.mxu1 %v4634_v43 }
  0xa3   :  { %1355 = vmatpush1.bf16.msra.mxu0 %v4629_v44  ;;  %1519 = vmatpush1.bf16.msra.mxu1 %v4632_v45 }
  0xa4   :  { %1356 = vmatprep.subr.bf16.mxu0 %v4637_v46  ;;  %1520 = vmatprep.subr.bf16.mxu1 %v4640_v47 }
  0xa7   :  { %1357 = vmatpush1.bf16.msra.mxu0 %v4635_v48  ;;  %1521 = vmatpush1.bf16.msra.mxu1 %v4638_v49 }
  0xa8   :  { %1358 = vmatprep.subr.bf16.mxu0 %v4643_v50  ;;  %1522 = vmatprep.subr.bf16.mxu1 %v4646_v51 }
  0xab   :  { %1359 = vmatpush1.bf16.msra.mxu0 %v4641_v52  ;;  %1523 = vmatpush1.bf16.msra.mxu1 %v4644_v53 }
  0xac   :  { %1360 = vmatprep.subr.bf16.mxu0 %v4649_v54  ;;  %1524 = vmatprep.subr.bf16.mxu1 %v4652_v55 }
  0xaf   :  { %1361 = vmatpush1.bf16.msra.mxu0 %v4647_v56  ;;  %1525 = vmatpush1.bf16.msra.mxu1 %v4650_v57 }
  0xb0   :  { %1362 = vmatprep.subr.bf16.mxu0 %v4655_v58  ;;  %1526 = vmatprep.subr.bf16.mxu1 %v4658_v59 }
  0xb3   :  { %1363 = vmatpush1.bf16.msra.mxu0 %v4653_v60  ;;  %1527 = vmatpush1.bf16.msra.mxu1 %v4656_v61 }
  0xb4   :  { %1364 = vmatprep.subr.bf16.mxu0 %v4661_v62  ;;  %1528 = vmatprep.subr.bf16.mxu1 %v4664_v63 }
  0xb7   :  { %1365 = vmatpush1.bf16.msra.mxu0 %v4659_v0  ;;  %1529 = vmatpush1.bf16.msra.mxu1 %v4662_v1 }
  0xb8   :  { %1366 = vmatprep.subr.bf16.mxu0 %v4667_v2  ;;  %1530 = vmatprep.subr.bf16.mxu1 %v4670_v3 }
  0xbb   :  { %1367 = vmatpush1.bf16.msra.mxu0 %v4665_v4  ;;  %1531 = vmatpush1.bf16.msra.mxu1 %v4668_v5 }
  0xbc   :  { %1368 = vmatprep.subr.bf16.mxu0 %v4673_v6  ;;  %1532 = vmatprep.subr.bf16.mxu1 %v4676_v7 }
  0xbf   :  { %1369 = vmatpush1.bf16.msra.mxu0 %v4671_v8  ;;  %1533 = vmatpush1.bf16.msra.mxu1 %v4674_v9 }
  0xc0   :  { %1379 = vmatprep.subr.bf16.mxu0 %v4679_v11  ;;  %1543 = vmatprep.subr.bf16.mxu1 %v4682_v12 }
  0xc2   :  { %1371 = vmatmul.mubr.bf16.vlgmr.msra.gmra.mrb[0].mxu0 %v51_v15  ;;  %1535 = vmatmul.mubr.bf16.vlgmr.msra.gmra.mrb[0].mxu1 %v51_v15 }
  0xc3   :  { %1380 = vmatpush1.bf16.msra.mxu0 %v4677_v13  ;;  %1544 = vmatpush1.bf16.msra.mxu1 %v4680_v14 }
  0xc4   :  { %1411 = vmatprep.mubr.bf16.mxu0 %v5134_v17  ;;  %1575 = vmatprep.mubr.bf16.mxu1 %v5134_v17 }
  0xc5   :  { %1907 = vmatprep.subr.bf16.mxu0 %v4685_v16 }
  0xce   :  { %4041 = vmatmul.mubr.msk.bf16.vlgmr.msra.gmra.mrb[0].mxu0 %vm1252_vm0, %v53_v20  ;;  %4042 = vmatmul.mubr.msk.bf16.vlgmr.msra.gmra.mrb[0].mxu1 %vm1252_vm0, %v53_v20 }
  0xcf   :  { %1908 = vmatpush1.bf16.msra.mxu0 %v4683_v19  ;;  %2242 = vmatprep.mubr.bf16.mxu1 %v5134_v17 }
  0xd0   :  { %1909 = vmatprep.subr.bf16.mxu0 %v4688_v21 }
  0xd3   :  { %1910 = vmatpush1.bf16.msra.mxu0 %v4686_v22 }
  0xd4   :  { %1911 = vmatprep.subr.bf16.mxu0 %v4691_v23 }
  0xd7   :  { %1912 = vmatpush1.bf16.msra.mxu0 %v4689_v24 }
  0xd8   :  { %1913 = vmatprep.subr.bf16.mxu0 %v4694_v25 }
  0xdb   :  { %1914 = vmatpush1.bf16.msra.mxu0 %v4692_v26 }
  0xdc   :  { %1915 = vmatprep.subr.bf16.mxu0 %v4697_v27 }
  0xdf   :  { %1916 = vmatpush1.bf16.msra.mxu0 %v4695_v28 }
  0xe0   :  { %1917 = vmatprep.subr.bf16.mxu0 %v4700_v29 }
  0xe3   :  { %1918 = vmatpush1.bf16.msra.mxu0 %v4698_v30 }
  0xe4   :  { %1919 = vmatprep.subr.bf16.mxu0 %v4703_v31 }
  0xe7   :  { %1920 = vmatpush1.bf16.msra.mxu0 %v4701_v32 }
  0xe8   :  { %1921 = vmatprep.subr.bf16.mxu0 %v4706_v33 }
  0xeb   :  { %1922 = vmatpush1.bf16.msra.mxu0 %v4704_v34 }
  0xec   :  { %18 = vsyncpa [#allocation5], 0  ;;  %1923 = vmatprep.subr.bf16.mxu0 %v4709_v35  ;;  %v4712_v37 = vld [vmem:[%s6710_s3 + $0x94] ss:$8 sps:$4 sm:$0xff]   ;;  %v4710_v38 = vld [vmem:[%s6710_s3 + $0x90] ss:$8 sps:$4 sm:$0xff]   ;;  %v252_v56 = vlaneseq }
  0xed   :  { %v4715_v39 = vld [vmem:[%s6710_s3 + $0xa4] ss:$8 sps:$4 sm:$0xff]   ;;  %v4713_v40 = vld [vmem:[%s6710_s3 + $0xa0] ss:$8 sps:$4 sm:$0xff]   ;;  %v4718_v41 = vld [vmem:[%s6710_s3 + $0xb4] ss:$8 sps:$4 sm:$0xff]  }
  0xee   :  { %v4716_v42 = vld [vmem:[%s6710_s3 + $0xb0] ss:$8 sps:$4 sm:$0xff]   ;;  %v4721_v43 = vld [vmem:[%s6710_s3 + $0xc4] ss:$8 sps:$4 sm:$0xff]   ;;  %v4719_v44 = vld [vmem:[%s6710_s3 + $0xc0] ss:$8 sps:$4 sm:$0xff]  }
  0xef   :  { %1924 = vmatpush1.bf16.msra.mxu0 %v4707_v36  ;;  %v4724_v45 = vld [vmem:[%s6710_s3 + $0xd4] ss:$8 sps:$4 sm:$0xff]   ;;  %v4722_v46 = vld [vmem:[%s6710_s3 + $0xd0] ss:$8 sps:$4 sm:$0xff]   ;;  %v4727_v47 = vld [vmem:[%s6710_s3 + $0xe4] ss:$8 sps:$4 sm:$0xff]  }
  0xf0   :  { %1925 = vmatprep.subr.bf16.mxu0 %v4712_v37  ;;  %v4725_v48 = vld [vmem:[%s6710_s3 + $0xe0] ss:$8 sps:$4 sm:$0xff]   ;;  %v4730_v49 = vld [vmem:[%s6710_s3 + $0xf4] ss:$8 sps:$4 sm:$0xff]   ;;  %v4728_v50 = vld [vmem:[%s6710_s3 + $0xf0] ss:$8 sps:$4 sm:$0xff]  }
  0xf1   :  { %v4733_v51 = vld [vmem:[%s6710_s3 + $0x104] ss:$8 sps:$4 sm:$0xff]   ;;  %v4758_v52 = vld [vmem:[%s6712_s5] ss:$16 sps:$4 sm:$0xff]   ;;  %v5922_v57 = vshrl.u32 %v252_v56, 7 }
  0xf2   :  { %v4760_v53 = vld [vmem:[%s6712_s5 + $0x4] ss:$16 sps:$4 sm:$0xff]   ;;  %v4761_v55 = vld [vmem:[%s6712_s5 + $0x20] ss:$16 sps:$4 sm:$0xff]  }
  0xf3   :  { %1926 = vmatpush1.bf16.msra.mxu0 %v4710_v38  ;;  %v4763_v54 = vld [vmem:[%s6712_s5 + $0x24] ss:$16 sps:$4 sm:$0xff]   ;;  %2210 = vmatprep.subr.bf16.mxu1 %v4760_v53  ;;  %v5925_v58 = vsub.s32 0, %v5922_v57  ;;  %v250_v59 = vld [vmem:[%s6709_s2] sm:$0xf]  ;;  %v5931_v60 = vsub.s32 1, %v5922_v57 }
  0xf4   :  { %1927 = vmatprep.subr.bf16.mxu0 %v4715_v39  ;;  %2211 = vmatpush1.bf16.msra.mxu1 %v4758_v52  ;;  %v5934_v61 = vsub.s32 3, %v5922_v57  ;;  %v4731_v16 = vld [vmem:[%s6710_s3 + $0x100] ss:$8 sps:$4 sm:$0xff]   ;;  %v4736_v19 = vld [vmem:[%s6710_s3 + $0x114] ss:$8 sps:$4 sm:$0xff]   ;;  %v5974_v30 = vsub.s32 2, %v5922_v57 }
  0xf5   :  { %2212 = vmatprep.subr.bf16.mxu1 %v4763_v54  ;;  %v255_v62 = vrot.slane %v250_v59, %v5925_v58  ;;  %v259_v63 = vrot.slane %v250_v59, %v5931_v60  ;;  %v4734_v21 = vld [vmem:[%s6710_s3 + $0x110] ss:$8 sps:$4 sm:$0xff]   ;;  %v4739_v22 = vld [vmem:[%s6710_s3 + $0x124] ss:$8 sps:$4 sm:$0xff]   ;;  %v4737_v23 = vld [vmem:[%s6710_s3 + $0x120] ss:$8 sps:$4 sm:$0xff]  }
  0xf6   :  { %v267_v0 = vrot.slane %v250_v59, %v5934_v61  ;;  %v4742_v24 = vld [vmem:[%s6710_s3 + $0x134] ss:$8 sps:$4 sm:$0xff]   ;;  %v4740_v25 = vld [vmem:[%s6710_s3 + $0x130] ss:$8 sps:$4 sm:$0xff]   ;;  %v4745_v26 = vld [vmem:[%s6710_s3 + $0x144] ss:$8 sps:$4 sm:$0xff]   ;;  %v263_v33 = vrot.slane %v250_v59, %v5974_v30 }
  0xf7   :  { %1928 = vmatpush1.bf16.msra.mxu0 %v4713_v40  ;;  %v4743_v27 = vld [vmem:[%s6710_s3 + $0x140] ss:$8 sps:$4 sm:$0xff]   ;;  %v4748_v28 = vld [vmem:[%s6710_s3 + $0x154] ss:$8 sps:$4 sm:$0xff]   ;;  %v4746_v29 = vld [vmem:[%s6710_s3 + $0x150] ss:$8 sps:$4 sm:$0xff]  }
  0xf8   :  { %1929 = vmatprep.subr.bf16.mxu0 %v4718_v41  ;;  %2213 = vmatpush1.bf16.msra.mxu1 %v4761_v55  ;;  %v4751_v31 = vld [vmem:[%s6710_s3 + $0x164] ss:$8 sps:$4 sm:$0xff]   ;;  %v4749_v32 = vld [vmem:[%s6710_s3 + $0x160] ss:$8 sps:$4 sm:$0xff]   ;;  %v4754_v34 = vld [vmem:[%s6710_s3 + $0x174] ss:$8 sps:$4 sm:$0xff]  }
  0xf9   :  { %v4752_v35 = vld [vmem:[%s6710_s3 + $0x170] ss:$8 sps:$4 sm:$0xff]   ;;  %v4757_v37 = vld [vmem:[%s6710_s3 + $0x184] ss:$8 sps:$4 sm:$0xff]   ;;  %v4755_v38 = vld [vmem:[%s6710_s3 + $0x180] ss:$8 sps:$4 sm:$0xff]  }
  0xfa   :  { %v4766_v41 = vld [vmem:[%s6712_s5 + $0x44] ss:$16 sps:$4 sm:$0xff]   ;;  %v4779_v52 = vld [vmem:[%s6712_s5 + $0xe0] ss:$16 sps:$4 sm:$0xff]   ;;  %v4784_v53 = vld [vmem:[%s6712_s5 + $0xc] ss:$16 sps:$4 sm:$0xff]  }
  0xfb   :  { %1930 = vmatpush1.bf16.msra.mxu0 %v4716_v42  ;;  %v4764_v42 = vld [vmem:[%s6712_s5 + $0x40] ss:$16 sps:$4 sm:$0xff]   ;;  %2214 = vmatprep.subr.bf16.mxu1 %v4766_v41  ;;  %v4809_v54 = vld [vmem:[%s6714_s7 + $0x8] ss:$28 sps:$4 sm:$0xff]   ;;  %v4787_v41 = vld [vmem:[%s6712_s5 + $0x2c] ss:$16 sps:$4 sm:$0xff]  }
  0xfc   :  { %1931 = vmatprep.subr.bf16.mxu0 %v4721_v43  ;;  %2215 = vmatpush1.bf16.msra.mxu1 %v4764_v42  ;;  %v4769_v43 = vld [vmem:[%s6712_s5 + $0x64] ss:$16 sps:$4 sm:$0xff]   ;;  %v4811_v55 = vld [vmem:[%s6714_s7 + $0xc] ss:$28 sps:$4 sm:$0xff]   ;;  %v4815_v59 = vld [vmem:[%s6714_s7 + $0x40] ss:$28 sps:$4 sm:$0xff]  }
  0xfd   :  { %2216 = vmatprep.subr.bf16.mxu1 %v4769_v43  ;;  %v4817_v56 = vld [vmem:[%s6714_s7 + $0x44] ss:$28 sps:$4 sm:$0xff]   ;;  %v4785_v42 = vld [vmem:[%s6712_s5 + $0x28] ss:$16 sps:$4 sm:$0xff]   ;;  %v4790_v43 = vld [vmem:[%s6712_s5 + $0x4c] ss:$16 sps:$4 sm:$0xff]  }
  0xff   :  { %1932 = vmatpush1.bf16.msra.mxu0 %v4719_v44  ;;  %v4767_v44 = vld [vmem:[%s6712_s5 + $0x60] ss:$16 sps:$4 sm:$0xff]  }
 0x100   :  { %1933 = vmatprep.subr.bf16.mxu0 %v4724_v45  ;;  %2217 = vmatpush1.bf16.msra.mxu1 %v4767_v44  ;;  %v4772_v45 = vld [vmem:[%s6712_s5 + $0x84] ss:$16 sps:$4 sm:$0xff]   ;;  %v4788_v44 = vld [vmem:[%s6712_s5 + $0x48] ss:$16 sps:$4 sm:$0xff]  }
 0x101   :  { %2218 = vmatprep.subr.bf16.mxu1 %v4772_v45  ;;  %v4793_v45 = vld [vmem:[%s6712_s5 + $0x6c] ss:$16 sps:$4 sm:$0xff]  }
 0x103   :  { %1934 = vmatpush1.bf16.msra.mxu0 %v4722_v46  ;;  %v4770_v46 = vld [vmem:[%s6712_s5 + $0x80] ss:$16 sps:$4 sm:$0xff]  }
 0x104   :  { %1935 = vmatprep.subr.bf16.mxu0 %v4727_v47  ;;  %v4775_v47 = vld [vmem:[%s6712_s5 + $0xa4] ss:$16 sps:$4 sm:$0xff]   ;;  %2219 = vmatpush1.bf16.msra.mxu1 %v4770_v46  ;;  %v4791_v46 = vld [vmem:[%s6712_s5 + $0x68] ss:$16 sps:$4 sm:$0xff]  }
 0x105   :  { %2220 = vmatprep.subr.bf16.mxu1 %v4775_v47  ;;  %v4796_v47 = vld [vmem:[%s6712_s5 + $0x8c] ss:$16 sps:$4 sm:$0xff]  }
 0x107   :  { %1936 = vmatpush1.bf16.msra.mxu0 %v4725_v48  ;;  %v4773_v48 = vld [vmem:[%s6712_s5 + $0xa0] ss:$16 sps:$4 sm:$0xff]  }
 0x108   :  { %1937 = vmatprep.subr.bf16.mxu0 %v4730_v49  ;;  %v4778_v49 = vld [vmem:[%s6712_s5 + $0xc4] ss:$16 sps:$4 sm:$0xff]   ;;  %2221 = vmatpush1.bf16.msra.mxu1 %v4773_v48  ;;  %v4794_v48 = vld [vmem:[%s6712_s5 + $0x88] ss:$16 sps:$4 sm:$0xff]  }
 0x109   :  { %2222 = vmatprep.subr.bf16.mxu1 %v4778_v49  ;;  %v4799_v49 = vld [vmem:[%s6712_s5 + $0xac] ss:$16 sps:$4 sm:$0xff]  }
 0x10b   :  { %1938 = vmatpush1.bf16.msra.mxu0 %v4728_v50  ;;  %v4776_v50 = vld [vmem:[%s6712_s5 + $0xc0] ss:$16 sps:$4 sm:$0xff]  }
 0x10c   :  { %1948 = vmatprep.subr.bf16.mxu0 %v4733_v51  ;;  %v4781_v51 = vld [vmem:[%s6712_s5 + $0xe4] ss:$16 sps:$4 sm:$0xff]   ;;  %2223 = vmatpush1.bf16.msra.mxu1 %v4776_v50  ;;  %v4797_v50 = vld [vmem:[%s6712_s5 + $0xa8] ss:$16 sps:$4 sm:$0xff]  }
 0x10d   :  { %2224 = vmatprep.subr.bf16.mxu1 %v4781_v51  ;;  %v4802_v51 = vld [vmem:[%s6712_s5 + $0xcc] ss:$16 sps:$4 sm:$0xff]  }
 0x110   :  { %2225 = vmatpush1.bf16.msra.mxu1 %v4779_v52  ;;  %v4800_v52 = vld [vmem:[%s6712_s5 + $0xc8] ss:$16 sps:$4 sm:$0xff]  }
 0x111   :  { %2251 = vmatprep.subr.bf16.mxu1 %v4784_v53  ;;  %v4805_v53 = vld [vmem:[%s6712_s5 + $0xec] ss:$16 sps:$4 sm:$0xff]  }
 0x1a1   :  { %v1413_v1 = vpop.f32.mrb[0].mxu0  ;;  %v1577_v2 = vpop.f32.mrb[0].mxu1 }
 0x1a2   :  { %v4334_v3 = vadd.f32 %v1413_v1, %v255_v62  ;;  %v1415_v4 = vpop.f32.mrb[1].mxu0  ;;  %v1579_v5 = vpop.f32.mrb[1].mxu1  ;;  %v4336_v36 = vadd.f32 %v1577_v2, %v263_v33  ;;  %v4823_v62 = vld [vmem:[%s6714_s7 + $0x7c] ss:$28 sps:$4 sm:$0xff]   ;;  %v4827_v1 = vld [vmem:[%s6714_s7 + $0xb0] ss:$28 sps:$4 sm:$0xff]  }
 0x1a3   :  { %v4335_v6 = vadd.f32 %v1415_v4, %v259_v63  ;;  %v4337_v7 = vadd.f32 %v1579_v5, %v267_v0  ;;  %v1417_v8 = vpop.f32.mrb[2].mxu0  ;;  %v1581_v9 = vpop.f32.mrb[2].mxu1  ;;  %v4821_v63 = vld [vmem:[%s6714_s7 + $0x78] ss:$28 sps:$4 sm:$0xff]   ;;  %v4835_v2 = vld [vmem:[%s6714_s7 + $0xec] ss:$28 sps:$4 sm:$0xff]  }
 0x1a4   :  { %v1584_v10 = vmax.f32 %v4334_v3, 0.0  ;;  %v1418_v11 = vpop.f32.mrb[3].mxu0  ;;  %v1582_v12 = vpop.f32.mrb[3].mxu1  ;;  %v1586_v39 = vmax.f32 %v4336_v36, 0.0  ;;  %v4829_v0 = vld [vmem:[%s6714_s7 + $0xb4] ss:$28 sps:$4 sm:$0xff]  }
 0x1a5   :  { %v1585_v13 = vmax.f32 %v4335_v6, 0.0  ;;  %v1587_v14 = vmax.f32 %v4337_v7, 0.0  ;;  %v4833_v3 = vld [vmem:[%s6714_s7 + $0xe8] ss:$28 sps:$4 sm:$0xff]   ;;  %v4839_v5 = vld [vmem:[%s6714_s7 + $0x120] ss:$28 sps:$4 sm:$0xff]  }
 0x1a6   :  { %v1588_v18 = vpack.c.bf16 %v1584_v10, %v1584_v10  ;;  %v1590_v40 = vpack.c.bf16 %v1586_v39, %v1586_v39  ;;  %v4841_v4 = vld [vmem:[%s6714_s7 + $0x124] ss:$28 sps:$4 sm:$0xff]   ;;  %v4847_v6 = vld [vmem:[%s6714_s7 + $0x15c] ss:$28 sps:$4 sm:$0xff]   ;;  %v4853_v8 = vld [vmem:[%s6714_s7 + $0x194] ss:$28 sps:$4 sm:$0xff]  }
 0x1a7   :  { %v1589_v15 = vpack.c.bf16 %v1585_v13, %v1585_v13  ;;  %v1591_v20 = vpack.c.bf16 %v1587_v14, %v1587_v14  ;;  %v4845_v7 = vld [vmem:[%s6714_s7 + $0x158] ss:$28 sps:$4 sm:$0xff]   ;;  %v4851_v9 = vld [vmem:[%s6714_s7 + $0x190] ss:$28 sps:$4 sm:$0xff]   ;;  %v4857_v11 = vld [vmem:[%s6714_s7 + $0x1c8] ss:$28 sps:$4 sm:$0xff]  }
 0x1a8   :  { %v4859_v10 = vld [vmem:[%s6714_s7 + $0x1cc] ss:$28 sps:$4 sm:$0xff]   ;;  %v4865_v12 = vld [vmem:[%s6714_s7 + $0x204] ss:$28 sps:$4 sm:$0xff]   ;;  %v4871_v14 = vld [vmem:[%s6714_s7 + $0x23c] ss:$28 sps:$4 sm:$0xff]  }
 0x1a9   :  { %1939 = vmatprep.mubr.bf16.mxu0 %v1589_v15  ;;  %v4863_v13 = vld [vmem:[%s6714_s7 + $0x200] ss:$28 sps:$4 sm:$0xff]   ;;  %v4869_v15 = vld [vmem:[%s6714_s7 + $0x238] ss:$28 sps:$4 sm:$0xff]  }
 0x1aa   :  { %1940 = vmatmul.mubr.bf16.vlgmr.msra.gmra.mrb[4].mxu0 %v1588_v18  ;;  %v4875_v18 = vld [vmem:[%s6714_s7 + $0x270] ss:$28 sps:$4 sm:$0xff]   ;;  %v4782_v39 = vld [vmem:[%s6712_s5 + $0x8] ss:$16 sps:$4 sm:$0xff]  }
 0x1ab   :  { %1949 = vmatpush1.bf16.msra.mxu0 %v4731_v16  ;;  %4093 = vmatprep.mubr.msk.bf16.mxu0 %vm1252_vm0, %v1591_v20  ;;  %v4877_v16 = vld [vmem:[%s6714_s7 + $0x274] ss:$28 sps:$4 sm:$0xff]   ;;  %v4881_v20 = vld [vmem:[%s6714_s7 + $0x2a8] ss:$28 sps:$4 sm:$0xff]  }
 0x1ac   :  { %1950 = vmatprep.subr.bf16.mxu0 %v4736_v19  ;;  %v4883_v19 = vld [vmem:[%s6714_s7 + $0x2ac] ss:$28 sps:$4 sm:$0xff]  }
 0x1af   :  { %1951 = vmatpush1.bf16.msra.mxu0 %v4734_v21  ;;  %v4889_v21 = vld [vmem:[%s6714_s7 + $0x2e4] ss:$28 sps:$4 sm:$0xff]  }
 0x1b0   :  { %1952 = vmatprep.subr.bf16.mxu0 %v4739_v22  ;;  %v4887_v22 = vld [vmem:[%s6714_s7 + $0x2e0] ss:$28 sps:$4 sm:$0xff]  }
 0x1b3   :  { %1953 = vmatpush1.bf16.msra.mxu0 %v4737_v23  ;;  %v1642_v23 = vld [vmem:[%s6711_s4] sm:$0x3] }
 0x1b4   :  { %1954 = vmatprep.subr.bf16.mxu0 %v4742_v24  ;;  %v1647_v24 = vrot.slane %v1642_v23, %v5925_v58 }
 0x1b7   :  { %1955 = vmatpush1.bf16.msra.mxu0 %v4740_v25  ;;  %v1651_v25 = vrot.slane %v1642_v23, %v5931_v60  ;;  %v4884_v23 = vld [vmem:[%s6714_s7 + $0x2d8] ss:$28 sps:$4 sm:$0xff]  }
 0x1b8   :  { %1956 = vmatprep.subr.bf16.mxu0 %v4745_v26 }
 0x1bb   :  { %1957 = vmatpush1.bf16.msra.mxu0 %v4743_v27 }
 0x1bc   :  { %1958 = vmatprep.subr.bf16.mxu0 %v4748_v28 }
 0x1bf   :  { %1959 = vmatpush1.bf16.msra.mxu0 %v4746_v29 }
 0x1c0   :  { %1960 = vmatprep.subr.bf16.mxu0 %v4751_v31 }
 0x1c3   :  { %1961 = vmatpush1.bf16.msra.mxu0 %v4749_v32 }
 0x1c4   :  { %1962 = vmatprep.subr.bf16.mxu0 %v4754_v34 }
 0x1c7   :  { %1963 = vmatpush1.bf16.msra.mxu0 %v4752_v35  ;;  %v1992_v35 = vld [vmem:[%s6716_s9] sm:$0xff] }
 0x1c8   :  { %1964 = vmatprep.subr.bf16.mxu0 %v4757_v37 }
 0x1cb   :  { %1965 = vmatpush1.bf16.msra.mxu0 %v4755_v38 }
 0x1cc   :  { %3522 = vmatprep.subr.bf16.mxu0 %v4811_v55  ;;  %v4808_v55 = vld [vmem:[%s6714_s7 + $0x4] ss:$28 sps:$4 sm:$0xff]  }
 0x1ce   :  { %1981 = vmatmul.mubr.bf16.vlgmr.msra.gmra.mrb[4].mxu0 %v1590_v40 }
 0x1cf   :  { %3523 = vmatpush1.bf16.msra.mxu0 %v4809_v54  ;;  %v4803_v54 = vld [vmem:[%s6712_s5 + $0xe8] ss:$16 sps:$4 sm:$0xff]  }
 0x1d0   :  { %3524 = vmatprep.subr.bf16.mxu0 %v4817_v56  ;;  %v4806_v56 = vld [vmem:[%s6714_s7] ss:$28 sps:$4 sm:$0xff]  }
 0x1d3   :  { %3525 = vmatpush1.bf16.msra.mxu0 %v4815_v59  ;;  %v4814_v59 = vld [vmem:[%s6714_s7 + $0x3c] ss:$28 sps:$4 sm:$0xff]  }
 0x1d4   :  { %3526 = vmatprep.subr.bf16.mxu0 %v4823_v62  ;;  %v4812_v62 = vld [vmem:[%s6714_s7 + $0x38] ss:$28 sps:$4 sm:$0xff]  }
 0x1d7   :  { %3527 = vmatpush1.bf16.msra.mxu0 %v4821_v63  ;;  %v4820_v63 = vld [vmem:[%s6714_s7 + $0x74] ss:$28 sps:$4 sm:$0xff]  }
 0x1d8   :  { %3528 = vmatprep.subr.bf16.mxu0 %v4829_v0  ;;  %v4818_v0 = vld [vmem:[%s6714_s7 + $0x70] ss:$28 sps:$4 sm:$0xff]  }
 0x1db   :  { %3529 = vmatpush1.bf16.msra.mxu0 %v4827_v1  ;;  %v4826_v1 = vld [vmem:[%s6714_s7 + $0xac] ss:$28 sps:$4 sm:$0xff]  }
 0x1dc   :  { %3530 = vmatprep.subr.bf16.mxu0 %v4835_v2  ;;  %v4824_v2 = vld [vmem:[%s6714_s7 + $0xa8] ss:$28 sps:$4 sm:$0xff]  }
 0x1df   :  { %3531 = vmatpush1.bf16.msra.mxu0 %v4833_v3  ;;  %v4832_v3 = vld [vmem:[%s6714_s7 + $0xe4] ss:$28 sps:$4 sm:$0xff]  }
 0x1e0   :  { %3532 = vmatprep.subr.bf16.mxu0 %v4841_v4  ;;  %v4830_v4 = vld [vmem:[%s6714_s7 + $0xe0] ss:$28 sps:$4 sm:$0xff]  }
 0x1e3   :  { %3533 = vmatpush1.bf16.msra.mxu0 %v4839_v5  ;;  %v4838_v5 = vld [vmem:[%s6714_s7 + $0x11c] ss:$28 sps:$4 sm:$0xff]  }
 0x1e4   :  { %3534 = vmatprep.subr.bf16.mxu0 %v4847_v6  ;;  %v4836_v6 = vld [vmem:[%s6714_s7 + $0x118] ss:$28 sps:$4 sm:$0xff]  }
 0x1e7   :  { %3535 = vmatpush1.bf16.msra.mxu0 %v4845_v7  ;;  %v4844_v7 = vld [vmem:[%s6714_s7 + $0x154] ss:$28 sps:$4 sm:$0xff]  }
 0x1e8   :  { %3536 = vmatprep.subr.bf16.mxu0 %v4853_v8  ;;  %v4842_v8 = vld [vmem:[%s6714_s7 + $0x150] ss:$28 sps:$4 sm:$0xff]  }
 0x1eb   :  { %3537 = vmatpush1.bf16.msra.mxu0 %v4851_v9  ;;  %v4850_v9 = vld [vmem:[%s6714_s7 + $0x18c] ss:$28 sps:$4 sm:$0xff]  }
 0x1ec   :  { %3538 = vmatprep.subr.bf16.mxu0 %v4859_v10  ;;  %v4848_v10 = vld [vmem:[%s6714_s7 + $0x188] ss:$28 sps:$4 sm:$0xff]  }
 0x1ef   :  { %3539 = vmatpush1.bf16.msra.mxu0 %v4857_v11  ;;  %v4856_v11 = vld [vmem:[%s6714_s7 + $0x1c4] ss:$28 sps:$4 sm:$0xff]  }
 0x1f0   :  { %3540 = vmatprep.subr.bf16.mxu0 %v4865_v12  ;;  %v4854_v12 = vld [vmem:[%s6714_s7 + $0x1c0] ss:$28 sps:$4 sm:$0xff]  }
 0x1f3   :  { %3541 = vmatpush1.bf16.msra.mxu0 %v4863_v13  ;;  %v4862_v13 = vld [vmem:[%s6714_s7 + $0x1fc] ss:$28 sps:$4 sm:$0xff]  }
 0x1f4   :  { %3542 = vmatprep.subr.bf16.mxu0 %v4871_v14  ;;  %v4860_v14 = vld [vmem:[%s6714_s7 + $0x1f8] ss:$28 sps:$4 sm:$0xff]  }
 0x1f7   :  { %3543 = vmatpush1.bf16.msra.mxu0 %v4869_v15  ;;  %v4868_v15 = vld [vmem:[%s6714_s7 + $0x234] ss:$28 sps:$4 sm:$0xff]  }
 0x1f8   :  { %3544 = vmatprep.subr.bf16.mxu0 %v4877_v16  ;;  %v4866_v16 = vld [vmem:[%s6714_s7 + $0x230] ss:$28 sps:$4 sm:$0xff]  }
 0x1fb   :  { %3545 = vmatpush1.bf16.msra.mxu0 %v4875_v18  ;;  %v4874_v18 = vld [vmem:[%s6714_s7 + $0x26c] ss:$28 sps:$4 sm:$0xff]  }
 0x1fc   :  { %3546 = vmatprep.subr.bf16.mxu0 %v4883_v19  ;;  %v4872_v19 = vld [vmem:[%s6714_s7 + $0x268] ss:$28 sps:$4 sm:$0xff]  }
 0x1ff   :  { %3547 = vmatpush1.bf16.msra.mxu0 %v4881_v20  ;;  %v4880_v20 = vld [vmem:[%s6714_s7 + $0x2a4] ss:$28 sps:$4 sm:$0xff]  }
 0x200   :  { %3548 = vmatprep.subr.bf16.mxu0 %v4889_v21  ;;  %v4878_v21 = vld [vmem:[%s6714_s7 + $0x2a0] ss:$28 sps:$4 sm:$0xff]  }
 0x203   :  { %3549 = vmatpush1.bf16.msra.mxu0 %v4887_v22  ;;  %v4886_v22 = vld [vmem:[%s6714_s7 + $0x2dc] ss:$28 sps:$4 sm:$0xff]  }
 0x2a1   :  { %v1982_v26 = vpop.f32.mrb[4].mxu0 }
 0x2a2   :  { %v4338_v27 = vadd.f32 %v1982_v26, %v1647_v24  ;;  %v1984_v28 = vpop.f32.mrb[5].mxu0  ;;  %v4892_v24 = vld [vmem:[%s6714_s7 + $0x314] ss:$28 sps:$4 sm:$0xff]  }
 0x2a3   :  { %v4339_v29 = vadd.f32 %v1984_v28, %v1651_v25  ;;  %v1986_v31 = vpop.f32.mrb[6].mxu0  ;;  %v4895_v25 = vld [vmem:[%s6714_s7 + $0x31c] ss:$28 sps:$4 sm:$0xff]   ;;  %v4898_v28 = vld [vmem:[%s6714_s7 + $0x34c] ss:$28 sps:$4 sm:$0xff]  }
 0x2a4   :  { %3815 = vst [vmem:[#allocation4] sm:$0xff] %v4338_v27  ;;  %v1987_v32 = vpop.f32.mrb[7].mxu0  ;;  %v4893_v26 = vld [vmem:[%s6714_s7 + $0x318] ss:$28 sps:$4 sm:$0xff]   ;;  %3550 = vmatprep.subr.bf16.mxu0 %v4895_v25  ;;  %v4899_v31 = vld [vmem:[%s6714_s7 + $0x350] ss:$28 sps:$4 sm:$0xff]  }
 0x2a5   :  { %v1989_v33 = vmul.f32 0.5, %v4339_v29  ;;  %3816 = vst [vmem:[#allocation4 + $0x8] sm:$0xff] %v4339_v29  ;;  %3551 = vmatpush1.bf16.msra.mxu0 %v4893_v26  ;;  %v4901_v29 = vld [vmem:[%s6714_s7 + $0x354] ss:$28 sps:$4 sm:$0xff]   ;;  %v4896_v32 = vld [vmem:[%s6714_s7 + $0x348] ss:$28 sps:$4 sm:$0xff]  }
 0x2a6   :  { %3552 = vmatprep.subr.bf16.mxu0 %v4901_v29 }
 0x2a7   :  { %v1990_v34 = vmul.f32 1.442695, %v1989_v33  ;;  %v4904_v33 = vld [vmem:[%s6714_s7 + $0x384] ss:$28 sps:$4 sm:$0xff]  }
 0x2a9   :  { %5056 = vpow2.f32 %v1990_v34  ;;  %3553 = vmatpush1.bf16.msra.mxu0 %v4899_v31  ;;  %v4907_v34 = vld [vmem:[%s6714_s7 + $0x38c] ss:$28 sps:$4 sm:$0xff]  }
 0x2aa   :  { %3563 = vmatprep.subr.bf16.mxu0 %v4907_v34 }
 0x2b3   :  { %v5057_v36 = vpop.eup %5056 }
 0x2b4   :  { %v1993_v37 = vmul.f32 %v5057_v36, %v1992_v35  ;;  %v6289_v35 = vld [vmem:[%s6713_s6] sm:$0xf] }
 0x2b5   :  { %v2033_v36 = vrot.slane %v6289_v35, %v5925_v58 }
 0x2b6   :  { %v1994_v38 = vadd.f32 %v4338_v27, %v1993_v37  ;;  %v4890_v27 = vld [vmem:[%s6714_s7 + $0x310] ss:$28 sps:$4 sm:$0xff]   ;;  %v2037_v37 = vrot.slane %v6289_v35, %v5931_v60 }
 0x2b8   :  { %v1995_v40 = vpack.c.bf16 %v1994_v38, %v1994_v38 }
 0x2ba   :  { %2243 = vmatmul.mubr.bf16.vlgmr.msra.gmra.mrb[4].mxu1 %v1995_v40 }
 0x2bb   :  { %2252 = vmatpush1.bf16.msra.mxu1 %v4782_v39  ;;  %2283 = vmatprep.mubr.bf16.mxu1 %v5134_v17 }
 0x2bc   :  { %2253 = vmatprep.subr.bf16.mxu1 %v4787_v41 }
 0x2bf   :  { %2254 = vmatpush1.bf16.msra.mxu1 %v4785_v42 }
 0x2c0   :  { %2255 = vmatprep.subr.bf16.mxu1 %v4790_v43 }
 0x2c3   :  { %2256 = vmatpush1.bf16.msra.mxu1 %v4788_v44 }
 0x2c4   :  { %2257 = vmatprep.subr.bf16.mxu1 %v4793_v45 }
 0x2c7   :  { %2258 = vmatpush1.bf16.msra.mxu1 %v4791_v46 }
 0x2c8   :  { %2259 = vmatprep.subr.bf16.mxu1 %v4796_v47  ;;  %v4902_v47 = vld [vmem:[%s6714_s7 + $0x380] ss:$28 sps:$4 sm:$0xff]  }
 0x2cb   :  { %2260 = vmatpush1.bf16.msra.mxu1 %v4794_v48  ;;  %v4905_v48 = vld [vmem:[%s6714_s7 + $0x388] ss:$28 sps:$4 sm:$0xff]  }
 0x2cc   :  { %2261 = vmatprep.subr.bf16.mxu1 %v4799_v49 }
 0x2cf   :  { %2262 = vmatpush1.bf16.msra.mxu1 %v4797_v50  ;;  %v4910_v50 = vld [vmem:[%s6714_s7 + $0x3bc] ss:$28 sps:$4 sm:$0xff]  }
 0x2d0   :  { %2263 = vmatprep.subr.bf16.mxu1 %v4802_v51  ;;  %v4913_v51 = vld [vmem:[%s6714_s7 + $0x3c4] ss:$28 sps:$4 sm:$0xff]  }
 0x2d3   :  { %2264 = vmatpush1.bf16.msra.mxu1 %v4800_v52  ;;  %v4908_v52 = vld [vmem:[%s6714_s7 + $0x3b8] ss:$28 sps:$4 sm:$0xff]  }
 0x2d4   :  { %2265 = vmatprep.subr.bf16.mxu1 %v4805_v53  ;;  %v4911_v53 = vld [vmem:[%s6714_s7 + $0x3c0] ss:$28 sps:$4 sm:$0xff]  }
 0x2d7   :  { %2266 = vmatpush1.bf16.msra.mxu1 %v4803_v54  ;;  %v4916_v54 = vld [vmem:[%s6714_s7 + $0x3f4] ss:$28 sps:$4 sm:$0xff]  }
 0x2d8   :  { %3440 = vmatprep.subr.bf16.mxu1 %v4808_v55  ;;  %v4919_v55 = vld [vmem:[%s6714_s7 + $0x3fc] ss:$28 sps:$4 sm:$0xff]  }
 0x2da   :  { %2284 = vmatmul.mubr.bf16.vlgmr.msra.gmra.mrb[8].mxu1 %v1995_v40 }
 0x2db   :  { %3441 = vmatpush1.bf16.msra.mxu1 %v4806_v56  ;;  %v4914_v56 = vld [vmem:[%s6714_s7 + $0x3f0] ss:$28 sps:$4 sm:$0xff]  }
 0x2dc   :  { %3442 = vmatprep.subr.bf16.mxu1 %v4814_v59  ;;  %v4917_v59 = vld [vmem:[%s6714_s7 + $0x3f8] ss:$28 sps:$4 sm:$0xff]  }
 0x2df   :  { %3443 = vmatpush1.bf16.msra.mxu1 %v4812_v62  ;;  %v4922_v62 = vld [vmem:[%s6714_s7 + $0x42c] ss:$28 sps:$4 sm:$0xff]  }
 0x2e0   :  { %3444 = vmatprep.subr.bf16.mxu1 %v4820_v63  ;;  %v4925_v63 = vld [vmem:[%s6714_s7 + $0x434] ss:$28 sps:$4 sm:$0xff]  }
 0x2e3   :  { %3445 = vmatpush1.bf16.msra.mxu1 %v4818_v0  ;;  %v4920_v0 = vld [vmem:[%s6714_s7 + $0x428] ss:$28 sps:$4 sm:$0xff]  }
 0x2e4   :  { %3446 = vmatprep.subr.bf16.mxu1 %v4826_v1  ;;  %v4923_v1 = vld [vmem:[%s6714_s7 + $0x430] ss:$28 sps:$4 sm:$0xff]  }
 0x2e7   :  { %3447 = vmatpush1.bf16.msra.mxu1 %v4824_v2  ;;  %v4928_v2 = vld [vmem:[%s6714_s7 + $0x464] ss:$28 sps:$4 sm:$0xff]  }
 0x2e8   :  { %3448 = vmatprep.subr.bf16.mxu1 %v4832_v3  ;;  %v4931_v3 = vld [vmem:[%s6714_s7 + $0x46c] ss:$28 sps:$4 sm:$0xff]  }
 0x2eb   :  { %3449 = vmatpush1.bf16.msra.mxu1 %v4830_v4  ;;  %v4926_v4 = vld [vmem:[%s6714_s7 + $0x460] ss:$28 sps:$4 sm:$0xff]  }
 0x2ec   :  { %3450 = vmatprep.subr.bf16.mxu1 %v4838_v5  ;;  %v4929_v5 = vld [vmem:[%s6714_s7 + $0x468] ss:$28 sps:$4 sm:$0xff]  }
 0x2ef   :  { %3451 = vmatpush1.bf16.msra.mxu1 %v4836_v6  ;;  %v4934_v6 = vld [vmem:[%s6714_s7 + $0x49c] ss:$28 sps:$4 sm:$0xff]  }
 0x2f0   :  { %3452 = vmatprep.subr.bf16.mxu1 %v4844_v7  ;;  %v4937_v7 = vld [vmem:[%s6714_s7 + $0x4a4] ss:$28 sps:$4 sm:$0xff]  }
 0x2f3   :  { %3453 = vmatpush1.bf16.msra.mxu1 %v4842_v8  ;;  %v4932_v8 = vld [vmem:[%s6714_s7 + $0x498] ss:$28 sps:$4 sm:$0xff]  }
 0x2f4   :  { %3454 = vmatprep.subr.bf16.mxu1 %v4850_v9  ;;  %v4935_v9 = vld [vmem:[%s6714_s7 + $0x4a0] ss:$28 sps:$4 sm:$0xff]  }
 0x2f7   :  { %3455 = vmatpush1.bf16.msra.mxu1 %v4848_v10  ;;  %v4940_v10 = vld [vmem:[%s6714_s7 + $0x4d4] ss:$28 sps:$4 sm:$0xff]  }
 0x2f8   :  { %3456 = vmatprep.subr.bf16.mxu1 %v4856_v11  ;;  %v4943_v11 = vld [vmem:[%s6714_s7 + $0x4dc] ss:$28 sps:$4 sm:$0xff]  }
 0x2fb   :  { %3457 = vmatpush1.bf16.msra.mxu1 %v4854_v12  ;;  %v2045_v12 = vrot.slane %v6289_v35, %v5934_v61 }
 0x2fc   :  { %3458 = vmatprep.subr.bf16.mxu1 %v4862_v13  ;;  %v4938_v13 = vld [vmem:[%s6714_s7 + $0x4d0] ss:$28 sps:$4 sm:$0xff]  }
 0x2ff   :  { %3459 = vmatpush1.bf16.msra.mxu1 %v4860_v14  ;;  %v4941_v14 = vld [vmem:[%s6714_s7 + $0x4d8] ss:$28 sps:$4 sm:$0xff]  }
 0x300   :  { %3460 = vmatprep.subr.bf16.mxu1 %v4868_v15  ;;  %v2041_v15 = vrot.slane %v6289_v35, %v5974_v30  ;;  %v4958_v35 = vld [vmem:[%s6714_s7 + $0x14] ss:$28 sps:$4 sm:$0xff]  }
 0x303   :  { %3461 = vmatpush1.bf16.msra.mxu1 %v4866_v16  ;;  %v4946_v16 = vld [vmem:[%s6714_s7 + $0x50c] ss:$28 sps:$4 sm:$0xff]  }
 0x304   :  { %3462 = vmatprep.subr.bf16.mxu1 %v4874_v18  ;;  %v4949_v18 = vld [vmem:[%s6714_s7 + $0x514] ss:$28 sps:$4 sm:$0xff]  }
 0x307   :  { %3463 = vmatpush1.bf16.msra.mxu1 %v4872_v19 }
 0x308   :  { %3464 = vmatprep.subr.bf16.mxu1 %v4880_v20 }
 0x30b   :  { %3465 = vmatpush1.bf16.msra.mxu1 %v4878_v21 }
 0x30c   :  { %3466 = vmatprep.subr.bf16.mxu1 %v4886_v22 }
 0x30f   :  { %3467 = vmatpush1.bf16.msra.mxu1 %v4884_v23  ;;  %v4944_v23 = vld [vmem:[%s6714_s7 + $0x508] ss:$28 sps:$4 sm:$0xff]  }
 0x310   :  { %3468 = vmatprep.subr.bf16.mxu1 %v4892_v24  ;;  %v4947_v24 = vld [vmem:[%s6714_s7 + $0x510] ss:$28 sps:$4 sm:$0xff]  }
 0x313   :  { %3469 = vmatpush1.bf16.msra.mxu1 %v4890_v27  ;;  %v4952_v27 = vld [vmem:[%s6714_s7 + $0x544] ss:$28 sps:$4 sm:$0xff]  }
 0x314   :  { %3470 = vmatprep.subr.bf16.mxu1 %v4898_v28  ;;  %v4955_v28 = vld [vmem:[%s6714_s7 + $0x54c] ss:$28 sps:$4 sm:$0xff]  }
 0x317   :  { %3471 = vmatpush1.bf16.msra.mxu1 %v4896_v32  ;;  %v4950_v32 = vld [vmem:[%s6714_s7 + $0x540] ss:$28 sps:$4 sm:$0xff]  }
 0x318   :  { %3481 = vmatprep.subr.bf16.mxu1 %v4904_v33  ;;  %v4953_v33 = vld [vmem:[%s6714_s7 + $0x548] ss:$28 sps:$4 sm:$0xff]  }
 0x38d   :  { %v2244_v38 = vpop.f32.mrb[4].mxu1 }
 0x38e   :  { %v2245_v39 = vadd.f32 %v2244_v38, %v2033_v36  ;;  %v2246_v40 = vpop.f32.mrb[5].mxu1  ;;  %v4959_v36 = vld [vmem:[%s6714_s7 + $0x1d8] ss:$28 sps:$4 sm:$0xff]  }
 0x38f   :  { %v2247_v41 = vadd.f32 %v2246_v40, %v2037_v37  ;;  %v2248_v42 = vpop.f32.mrb[6].mxu1  ;;  %v4956_v37 = vld [vmem:[%s6714_s7 + $0x10] ss:$28 sps:$4 sm:$0xff]  }
 0x390   :  { %v2292_v43 = vmax.f32 %v2245_v39, 0.0  ;;  %v2249_v44 = vpop.f32.mrb[7].mxu1  ;;  %v4960_v39 = vld [vmem:[%s6714_s7 + $0x18] ss:$28 sps:$4 sm:$0xff]   ;;  %v4963_v40 = vld [vmem:[%s6714_s7 + $0x4c] ss:$28 sps:$4 sm:$0xff]  }
 0x391   :  { %v2293_v45 = vmax.f32 %v2247_v41, 0.0  ;;  %v4964_v41 = vld [vmem:[%s6714_s7 + $0x210] ss:$28 sps:$4 sm:$0xff]   ;;  %v4961_v42 = vld [vmem:[%s6714_s7 + $0x48] ss:$28 sps:$4 sm:$0xff]  }
 0x392   :  { %v6303_v49 = vpack.c.bf16 %v2292_v43, %v2292_v43  ;;  %v4965_v43 = vld [vmem:[%s6714_s7 + $0x50] ss:$28 sps:$4 sm:$0xff]   ;;  %v4968_v44 = vld [vmem:[%s6714_s7 + $0x84] ss:$28 sps:$4 sm:$0xff]  }
 0x393   :  { %v6295_v46 = vpack.c.bf16 %v2293_v45, %v2293_v45  ;;  %v4969_v45 = vld [vmem:[%s6714_s7 + $0x248] ss:$28 sps:$4 sm:$0xff]  }
 0x395   :  { %3472 = vmatprep.mubr.bf16.mxu1 %v6295_v46  ;;  %3554 = vmatprep.mubr.bf16.mxu0 %v6295_v46 }
 0x396   :  { %3473 = vmatmul.mubr.bf16.vlgmr.msra.gmra.mrb[12].mxu1 %v6303_v49  ;;  %3555 = vmatmul.mubr.bf16.vlgmr.msra.gmra.mrb[8].mxu0 %v6303_v49 }
 0x397   :  { %3482 = vmatpush1.bf16.msra.mxu1 %v4902_v47  ;;  %3564 = vmatpush1.bf16.msra.mxu0 %v4905_v48  ;;  %v4966_v47 = vld [vmem:[%s6714_s7 + $0x80] ss:$28 sps:$4 sm:$0xff]  }
 0x398   :  { %3483 = vmatprep.subr.bf16.mxu1 %v4910_v50  ;;  %3565 = vmatprep.subr.bf16.mxu0 %v4913_v51  ;;  %v4973_v48 = vld [vmem:[%s6714_s7 + $0xbc] ss:$28 sps:$4 sm:$0xff]  }
 0x399   :  { %v4974_v50 = vld [vmem:[%s6714_s7 + $0x280] ss:$28 sps:$4 sm:$0xff]   ;;  %v4971_v51 = vld [vmem:[%s6714_s7 + $0xb8] ss:$28 sps:$4 sm:$0xff]  }
 0x39b   :  { %3484 = vmatpush1.bf16.msra.mxu1 %v4908_v52  ;;  %3566 = vmatpush1.bf16.msra.mxu0 %v4911_v53  ;;  %v4975_v52 = vld [vmem:[%s6714_s7 + $0xc0] ss:$28 sps:$4 sm:$0xff]   ;;  %v4978_v53 = vld [vmem:[%s6714_s7 + $0xf4] ss:$28 sps:$4 sm:$0xff]  }
 0x39c   :  { %3485 = vmatprep.subr.bf16.mxu1 %v4916_v54  ;;  %3567 = vmatprep.subr.bf16.mxu0 %v4919_v55  ;;  %v4979_v54 = vld [vmem:[%s6714_s7 + $0x2b8] ss:$28 sps:$4 sm:$0xff]   ;;  %v4976_v55 = vld [vmem:[%s6714_s7 + $0xf0] ss:$28 sps:$4 sm:$0xff]  }
 0x39f   :  { %3486 = vmatpush1.bf16.msra.mxu1 %v4914_v56  ;;  %3568 = vmatpush1.bf16.msra.mxu0 %v4917_v59  ;;  %v4980_v56 = vld [vmem:[%s6714_s7 + $0xf8] ss:$28 sps:$4 sm:$0xff]   ;;  %v4983_v59 = vld [vmem:[%s6714_s7 + $0x12c] ss:$28 sps:$4 sm:$0xff]  }
 0x3a0   :  { %3487 = vmatprep.subr.bf16.mxu1 %v4922_v62  ;;  %3569 = vmatprep.subr.bf16.mxu0 %v4925_v63  ;;  %v4984_v62 = vld [vmem:[%s6714_s7 + $0x2f0] ss:$28 sps:$4 sm:$0xff]   ;;  %v4981_v63 = vld [vmem:[%s6714_s7 + $0x128] ss:$28 sps:$4 sm:$0xff]  }
 0x3a3   :  { %3488 = vmatpush1.bf16.msra.mxu1 %v4920_v0  ;;  %3570 = vmatpush1.bf16.msra.mxu0 %v4923_v1  ;;  %v4985_v0 = vld [vmem:[%s6714_s7 + $0x130] ss:$28 sps:$4 sm:$0xff]   ;;  %v4988_v1 = vld [vmem:[%s6714_s7 + $0x164] ss:$28 sps:$4 sm:$0xff]  }
 0x3a4   :  { %3489 = vmatprep.subr.bf16.mxu1 %v4928_v2  ;;  %3571 = vmatprep.subr.bf16.mxu0 %v4931_v3  ;;  %v4989_v2 = vld [vmem:[%s6714_s7 + $0x328] ss:$28 sps:$4 sm:$0xff]   ;;  %v4986_v3 = vld [vmem:[%s6714_s7 + $0x160] ss:$28 sps:$4 sm:$0xff]  }
 0x3a7   :  { %3490 = vmatpush1.bf16.msra.mxu1 %v4926_v4  ;;  %3572 = vmatpush1.bf16.msra.mxu0 %v4929_v5  ;;  %v4990_v4 = vld [vmem:[%s6714_s7 + $0x168] ss:$28 sps:$4 sm:$0xff]   ;;  %v4993_v5 = vld [vmem:[%s6714_s7 + $0x19c] ss:$28 sps:$4 sm:$0xff]  }
 0x3a8   :  { %3491 = vmatprep.subr.bf16.mxu1 %v4934_v6  ;;  %3573 = vmatprep.subr.bf16.mxu0 %v4937_v7  ;;  %v4994_v6 = vld [vmem:[%s6714_s7 + $0x360] ss:$28 sps:$4 sm:$0xff]   ;;  %v4991_v7 = vld [vmem:[%s6714_s7 + $0x198] ss:$28 sps:$4 sm:$0xff]  }
 0x3ab   :  { %3492 = vmatpush1.bf16.msra.mxu1 %v4932_v8  ;;  %3574 = vmatpush1.bf16.msra.mxu0 %v4935_v9  ;;  %v4995_v8 = vld [vmem:[%s6714_s7 + $0x1a0] ss:$28 sps:$4 sm:$0xff]   ;;  %v4998_v9 = vld [vmem:[%s6714_s7 + $0x1d4] ss:$28 sps:$4 sm:$0xff]  }
 0x3ac   :  { %3493 = vmatprep.subr.bf16.mxu1 %v4940_v10  ;;  %3575 = vmatprep.subr.bf16.mxu0 %v4943_v11  ;;  %v4996_v10 = vld [vmem:[%s6714_s7 + $0x1d0] ss:$28 sps:$4 sm:$0xff]   ;;  %v4999_v11 = vld [vmem:[%s6714_s7 + $0x398] ss:$28 sps:$4 sm:$0xff]  }
 0x3ad   :  { %v2285_v19 = vpop.f32.mrb[8].mxu1 }
 0x3ae   :  { %v2287_v20 = vpop.f32.mrb[9].mxu1  ;;  %v2286_v25 = vadd.f32 %v2285_v19, %v2041_v15  ;;  %v5006_v15 = vld [vmem:[%s6714_s7 + $0x244] ss:$28 sps:$4 sm:$0xff]   ;;  %v5010_v19 = vld [vmem:[%s6714_s7 + $0x27c] ss:$28 sps:$4 sm:$0xff]  }
 0x3af   :  { %v2288_v21 = vadd.f32 %v2287_v20, %v2045_v12  ;;  %v2289_v22 = vpop.f32.mrb[10].mxu1  ;;  %3494 = vmatpush1.bf16.msra.mxu1 %v4938_v13  ;;  %3576 = vmatpush1.bf16.msra.mxu0 %v4941_v14  ;;  %v5002_v12 = vld [vmem:[%s6714_s7 + $0x20c] ss:$28 sps:$4 sm:$0xff]   ;;  %v5008_v20 = vld [vmem:[%s6714_s7 + $0x278] ss:$28 sps:$4 sm:$0xff]  }
 0x3b0   :  { %v2290_v26 = vpop.f32.mrb[11].mxu1  ;;  %3495 = vmatprep.subr.bf16.mxu1 %v4946_v16  ;;  %3577 = vmatprep.subr.bf16.mxu0 %v4949_v18  ;;  %v2294_v34 = vmax.f32 %v2286_v25, 0.0  ;;  %v5000_v13 = vld [vmem:[%s6714_s7 + $0x208] ss:$28 sps:$4 sm:$0xff]   ;;  %v5003_v14 = vld [vmem:[%s6714_s7 + $0x3d0] ss:$28 sps:$4 sm:$0xff]  }
 0x3b1   :  { %v2295_v29 = vmax.f32 %v2288_v21, 0.0  ;;  %v5004_v16 = vld [vmem:[%s6714_s7 + $0x240] ss:$28 sps:$4 sm:$0xff]   ;;  %v5007_v18 = vld [vmem:[%s6714_s7 + $0x408] ss:$28 sps:$4 sm:$0xff]  }
 0x3b2   :  { %v6424_v38 = vpack.c.bf16 %v2294_v34, %v2294_v34  ;;  %v5011_v21 = vld [vmem:[%s6714_s7 + $0x440] ss:$28 sps:$4 sm:$0xff]   ;;  %v5014_v22 = vld [vmem:[%s6714_s7 + $0x2b4] ss:$28 sps:$4 sm:$0xff]   ;;  %v5018_v25 = vld [vmem:[%s6714_s7 + $0x2ec] ss:$28 sps:$4 sm:$0xff]  }
 0x3b3   :  { %v6403_v31 = vpack.c.bf16 %v2295_v29, %v2295_v29  ;;  %3496 = vmatpush1.bf16.msra.mxu1 %v4944_v23  ;;  %3578 = vmatpush1.bf16.msra.mxu0 %v4947_v24  ;;  %v5012_v23 = vld [vmem:[%s6714_s7 + $0x2b0] ss:$28 sps:$4 sm:$0xff]   ;;  %v5015_v24 = vld [vmem:[%s6714_s7 + $0x478] ss:$28 sps:$4 sm:$0xff]   ;;  %v5016_v26 = vld [vmem:[%s6714_s7 + $0x2e8] ss:$28 sps:$4 sm:$0xff]  }
 0x3b4   :  { %3497 = vmatprep.subr.bf16.mxu1 %v4952_v27  ;;  %3579 = vmatprep.subr.bf16.mxu0 %v4955_v28  ;;  %v5019_v27 = vld [vmem:[%s6714_s7 + $0x4b0] ss:$28 sps:$4 sm:$0xff]   ;;  %v5022_v28 = vld [vmem:[%s6714_s7 + $0x324] ss:$28 sps:$4 sm:$0xff]   ;;  %v5024_v34 = vld [vmem:[%s6714_s7 + $0x358] ss:$28 sps:$4 sm:$0xff]  }
 0x3b5   :  { %4301 = vmatprep.mubr.msk.bf16.mxu1 %vm1252_vm0, %v6403_v31  ;;  %4302 = vmatprep.mubr.msk.bf16.mxu0 %vm1252_vm0, %v6403_v31  ;;  %v5020_v29 = vld [vmem:[%s6714_s7 + $0x320] ss:$28 sps:$4 sm:$0xff]  }
 0x3b7   :  { %3498 = vmatpush1.bf16.msra.mxu1 %v4950_v32  ;;  %3580 = vmatpush1.bf16.msra.mxu0 %v4953_v33  ;;  %v5023_v32 = vld [vmem:[%s6714_s7 + $0x4e8] ss:$28 sps:$4 sm:$0xff]   ;;  %v5026_v33 = vld [vmem:[%s6714_s7 + $0x35c] ss:$28 sps:$4 sm:$0xff]  }
 0x3b8   :  { %3604 = vmatprep.subr.bf16.mxu1 %v4958_v35  ;;  %4312 = vmatprep.subr.bf16.mxu0 %v4959_v36  ;;  %v5027_v35 = vld [vmem:[%s6714_s7 + $0x520] ss:$28 sps:$4 sm:$0xff]   ;;  %v5030_v36 = vld [vmem:[%s6714_s7 + $0x394] ss:$28 sps:$4 sm:$0xff]  }
 0x3ba   :  { %3514 = vmatmul.mubr.bf16.vlgmr.msra.gmra.mrb[12].mxu1 %v6424_v38  ;;  %3596 = vmatmul.mubr.bf16.vlgmr.msra.gmra.mrb[8].mxu0 %v6424_v38 }
 0x3bb   :  { %3605 = vmatpush1.bf16.msra.mxu1 %v4956_v37  ;;  %3636 = vmatprep.mubr.bf16.mxu1 %v6295_v46  ;;  %v5028_v37 = vld [vmem:[%s6714_s7 + $0x390] ss:$28 sps:$4 sm:$0xff]  }
 0x3bc   :  { %4313 = vmatpush3.bf16.msra.mxu0 %v4960_v39  ;;  %3718 = vmatprep.mubr.bf16.mxu0 %v6295_v46  ;;  %v4970_v46 = vld [vmem:[%s6714_s7 + $0x88] ss:$28 sps:$4 sm:$0xff]   ;;  %v5031_v39 = vld [vmem:[%s6714_s7 + $0x558] ss:$28 sps:$4 sm:$0xff]  }
 0x3bd   :  { %3606 = vmatprep.subr.bf16.mxu1 %v4963_v40  ;;  %4314 = vmatprep.subr.bf16.mxu0 %v4964_v41  ;;  %v5034_v40 = vld [vmem:[%s6714_s7 + $0x3cc] ss:$28 sps:$4 sm:$0xff]  }
 0x3be   :  { %v5032_v41 = vld [vmem:[%s6714_s7 + $0x3c8] ss:$28 sps:$4 sm:$0xff]  }
 0x3bf   :  { %3607 = vmatpush1.bf16.msra.mxu1 %v4961_v42  ;;  %v5037_v42 = vld [vmem:[%s6714_s7 + $0x404] ss:$28 sps:$4 sm:$0xff]  }
 0x3c0   :  { %4315 = vmatpush3.bf16.msra.mxu0 %v4965_v43  ;;  %3608 = vmatprep.subr.bf16.mxu1 %v4968_v44  ;;  %v5043_v43 = vld [vmem:[%s6714_s7 + $0x474] ss:$28 sps:$4 sm:$0xff]  }
 0x3c1   :  { %4316 = vmatprep.subr.bf16.mxu0 %v4969_v45  ;;  %v5041_v44 = vld [vmem:[%s6714_s7 + $0x470] ss:$28 sps:$4 sm:$0xff]  }
 0x3c2   :  { %v5046_v45 = vld [vmem:[%s6714_s7 + $0x4ac] ss:$28 sps:$4 sm:$0xff]  }
 0x3c3   :  { %3609 = vmatpush1.bf16.msra.mxu1 %v4966_v47  ;;  %v5044_v47 = vld [vmem:[%s6714_s7 + $0x4a8] ss:$28 sps:$4 sm:$0xff]  }
 0x3c4   :  { %4317 = vmatpush3.bf16.msra.mxu0 %v4970_v46  ;;  %3610 = vmatprep.subr.bf16.mxu1 %v4973_v48  ;;  %v5049_v46 = vld [vmem:[%s6714_s7 + $0x4e4] ss:$28 sps:$4 sm:$0xff]  }
 0x3c5   :  { %4318 = vmatprep.subr.bf16.mxu0 %v4974_v50  ;;  %v5047_v48 = vld [vmem:[%s6714_s7 + $0x4e0] ss:$28 sps:$4 sm:$0xff]  }
 0x3c6   :  { %v5052_v50 = vld [vmem:[%s6714_s7 + $0x51c] ss:$28 sps:$4 sm:$0xff]  }
 0x3c7   :  { %3611 = vmatpush1.bf16.msra.mxu1 %v4971_v51  ;;  %v5050_v51 = vld [vmem:[%s6714_s7 + $0x518] ss:$28 sps:$4 sm:$0xff]  }
 0x3c8   :  { %4319 = vmatpush3.bf16.msra.mxu0 %v4975_v52  ;;  %3612 = vmatprep.subr.bf16.mxu1 %v4978_v53  ;;  %v5055_v52 = vld [vmem:[%s6714_s7 + $0x554] ss:$28 sps:$4 sm:$0xff]  }
 0x3c9   :  { %4320 = vmatprep.subr.bf16.mxu0 %v4979_v54  ;;  %v5053_v53 = vld [vmem:[%s6714_s7 + $0x550] ss:$28 sps:$4 sm:$0xff]   ;;  %v6666_v54 = vld [vmem:[%s6715_s8] sm:$0x7f] }
 0x3cb   :  { %3613 = vmatpush1.bf16.msra.mxu1 %v4976_v55  ;;  %v2505_v55 = vrot.slane %v6666_v54, %v5925_v58 }
 0x3cc   :  { %4321 = vmatpush3.bf16.msra.mxu0 %v4980_v56  ;;  %3614 = vmatprep.subr.bf16.mxu1 %v4983_v59  ;;  %v2513_v56 = vrot.slane %v6666_v54, %v5974_v30  ;;  %v2509_v59 = vrot.slane %v6666_v54, %v5931_v60 }
 0x3cd   :  { %4322 = vmatprep.subr.bf16.mxu0 %v4984_v62  ;;  %v2517_v62 = vrot.slane %v6666_v54, %v5934_v61 }
 0x3cf   :  { %3615 = vmatpush1.bf16.msra.mxu1 %v4981_v63 }
 0x3d0   :  { %4323 = vmatpush3.bf16.msra.mxu0 %v4985_v0  ;;  %3616 = vmatprep.subr.bf16.mxu1 %v4988_v1 }
 0x3d1   :  { %4324 = vmatprep.subr.bf16.mxu0 %v4989_v2 }
 0x3d3   :  { %3617 = vmatpush1.bf16.msra.mxu1 %v4986_v3 }
 0x3d4   :  { %4325 = vmatpush3.bf16.msra.mxu0 %v4990_v4  ;;  %3618 = vmatprep.subr.bf16.mxu1 %v4993_v5 }
 0x3d5   :  { %4326 = vmatprep.subr.bf16.mxu0 %v4994_v6 }
 0x3d7   :  { %3619 = vmatpush1.bf16.msra.mxu1 %v4991_v7 }
 0x3d8   :  { %4327 = vmatpush3.bf16.msra.mxu0 %v4995_v8  ;;  %3620 = vmatprep.subr.bf16.mxu1 %v4998_v9 }
 0x3d9   :  { %3726 = vmatprep.subr.bf16.mxu0 %v5134_v17 }
 0x3db   :  { %3719 = vmatmul.mubr.bf16.vlgmr.msra.gmra.mrb[12].mxu0 %v6303_v49  ;;  %3621 = vmatpush1.bf16.msra.mxu1 %v4996_v10 }
 0x3dc   :  { %3727 = vmatpush1.bf16.msra.mxu0 %v4999_v11  ;;  %4304 = vmatprep.mubr.msk.bf16.mxu0 %vm1252_vm0, %v6403_v31 }
 0x3dd   :  { %3622 = vmatprep.subr.bf16.mxu1 %v5002_v12  ;;  %3728 = vmatprep.subr.bf16.mxu0 %v5134_v17 }
 0x3df   :  { %3623 = vmatpush1.bf16.msra.mxu1 %v5000_v13 }
 0x3e0   :  { %3729 = vmatpush1.bf16.msra.mxu0 %v5003_v14  ;;  %3624 = vmatprep.subr.bf16.mxu1 %v5006_v15 }
 0x3e1   :  { %3730 = vmatprep.subr.bf16.mxu0 %v5134_v17 }
 0x3e3   :  { %3625 = vmatpush1.bf16.msra.mxu1 %v5004_v16 }
 0x3e4   :  { %3731 = vmatpush1.bf16.msra.mxu0 %v5007_v18  ;;  %3626 = vmatprep.subr.bf16.mxu1 %v5010_v19 }
 0x3e5   :  { %3732 = vmatprep.subr.bf16.mxu0 %v5134_v17 }
 0x3e7   :  { %3627 = vmatpush1.bf16.msra.mxu1 %v5008_v20 }
 0x3e8   :  { %3733 = vmatpush1.bf16.msra.mxu0 %v5011_v21  ;;  %3628 = vmatprep.subr.bf16.mxu1 %v5014_v22 }
 0x3e9   :  { %3734 = vmatprep.subr.bf16.mxu0 %v5134_v17 }
 0x3eb   :  { %3629 = vmatpush1.bf16.msra.mxu1 %v5012_v23 }
 0x3ec   :  { %3735 = vmatpush1.bf16.msra.mxu0 %v5015_v24  ;;  %3630 = vmatprep.subr.bf16.mxu1 %v5018_v25 }
 0x3ed   :  { %3736 = vmatprep.subr.bf16.mxu0 %v5134_v17 }
 0x3ef   :  { %3631 = vmatpush1.bf16.msra.mxu1 %v5016_v26 }
 0x3f0   :  { %3737 = vmatpush1.bf16.msra.mxu0 %v5019_v27  ;;  %3632 = vmatprep.subr.bf16.mxu1 %v5022_v28 }
 0x3f1   :  { %3738 = vmatprep.subr.bf16.mxu0 %v5134_v17 }
 0x3f3   :  { %3633 = vmatpush1.bf16.msra.mxu1 %v5020_v29 }
 0x3f4   :  { %3739 = vmatpush1.bf16.msra.mxu0 %v5023_v32  ;;  %3634 = vmatprep.subr.bf16.mxu1 %v5026_v33 }
 0x3f5   :  { %3740 = vmatprep.subr.bf16.mxu0 %v5134_v17 }
 0x3f7   :  { %3635 = vmatpush1.bf16.msra.mxu1 %v5024_v34 }
 0x3f8   :  { %3741 = vmatpush1.bf16.msra.mxu0 %v5027_v35  ;;  %3645 = vmatprep.subr.bf16.mxu1 %v5030_v36 }
 0x3f9   :  { %3742 = vmatprep.subr.bf16.mxu0 %v5134_v17  ;;  %v5035_v17 = vld [vmem:[%s6714_s7 + $0x400] ss:$28 sps:$4 sm:$0xff]  }
 0x3fa   :  { %3637 = vmatmul.mubr.bf16.vlgmr.msra.gmra.mrb[16].mxu1 %v6303_v49  ;;  %v5040_v49 = vld [vmem:[%s6714_s7 + $0x43c] ss:$28 sps:$4 sm:$0xff]  }
 0x3fb   :  { %3646 = vmatpush1.bf16.msra.mxu1 %v5028_v37  ;;  %4303 = vmatprep.mubr.msk.bf16.mxu1 %vm1252_vm0, %v6403_v31  ;;  %v5038_v31 = vld [vmem:[%s6714_s7 + $0x438] ss:$28 sps:$4 sm:$0xff]   ;;  %s5135_s7 = smov [#allocation4]  }
 0x3fc   :  { %3743 = vmatpush1.bf16.msra.mxu0 %v5031_v39  ;;  %3647 = vmatprep.subr.bf16.mxu1 %v5034_v40  ;;  %s3833_s8 = sshll.u32 %s5135_s7, 4  ;;  %s3834_s8 = int_to_ptr.vmem [resolvable:$true] %s3833_s8 }
 0x3fd   :  { %s5086_s26 = scalar_lea.vmem %s3834_s8, 256  ;;  %p5091_p1 = scmp.lt.s32.totalorder %s3834_s8, %s3834_s8 }
 0x3fe   :  { %p5087_p0 = scmp.ne.s32.totalorder %s3834_s8, %s5086_s26  ;;  %p5092_p2 = scmp.lt.s32.totalorder %s5086_s26, %s5086_s26 }
 0x3ff   :  { %3759 = vmatmul.mubr.bf16.vlgmr.msra.gmra.mrb[16].mxu0 %v6424_v38  ;;  %3648 = vmatpush1.bf16.msra.mxu1 %v5032_v41 }
 0x400   :  { %3649 = vmatprep.subr.bf16.mxu1 %v5037_v42  ;;  %p5093_p3 = por %p5092_p2, %p5091_p1 }
 0x402   :  { %p5094_p4 = pnand %p5093_p3, %p5087_p0 }
 0x403   :  { %3650 = vmatpush1.bf16.msra.mxu1 %v5035_v17 }
 0x404   :  { %3651 = vmatprep.subr.bf16.mxu1 %v5040_v49 }
 0x407   :  { %3652 = vmatpush1.bf16.msra.mxu1 %v5038_v31 }
 0x408   :  { %3653 = vmatprep.subr.bf16.mxu1 %v5043_v43 }
 0x40b   :  { %3654 = vmatpush1.bf16.msra.mxu1 %v5041_v44 }
 0x40c   :  { %3655 = vmatprep.subr.bf16.mxu1 %v5046_v45 }
 0x40f   :  { %3656 = vmatpush1.bf16.msra.mxu1 %v5044_v47 }
 0x410   :  { %3657 = vmatprep.subr.bf16.mxu1 %v5049_v46 }
 0x413   :  { %3658 = vmatpush1.bf16.msra.mxu1 %v5047_v48 }
 0x414   :  { %3659 = vmatprep.subr.bf16.mxu1 %v5052_v50 }
 0x417   :  { %3660 = vmatpush1.bf16.msra.mxu1 %v5050_v51 }
 0x418   :  { %3661 = vmatprep.subr.bf16.mxu1 %v5055_v52 }
 0x41b   :  { %3662 = vmatpush1.bf16.msra.mxu1 %v5053_v53 }
 0x41e   :  { %3678 = vmatmul.mubr.bf16.vlgmr.msra.gmra.mrb[16].mxu1 %v6424_v38 }
 0x48d   :  { %v3515_v63 = vpop.f32.mrb[12].mxu1  ;;  %v3597_v0 = vpop.f32.mrb[8].mxu0 }
 0x48e   :  { %v4340_v38 = vadd.f32 %v3515_v63, %v2505_v55  ;;  %v4342_v1 = vadd.f32 %v3597_v0, %v2513_v56  ;;  %v3517_v2 = vpop.f32.mrb[13].mxu1  ;;  %v3599_v3 = vpop.f32.mrb[9].mxu0 }
 0x48f   :  { %v4341_v4 = vadd.f32 %v3517_v2, %v2509_v59  ;;  %v4343_v5 = vadd.f32 %v3599_v3, %v2517_v62  ;;  %v3519_v6 = vpop.f32.mrb[14].mxu1  ;;  %v3601_v7 = vpop.f32.mrb[10].mxu0 }
 0x490   :  { %v4305_v58 = vmul.f32 -1.442695, %v4340_v38  ;;  %v4307_v8 = vmul.f32 -1.442695, %v4342_v1  ;;  %v3520_v9 = vpop.f32.mrb[15].mxu1  ;;  %v3602_v30 = vpop.f32.mrb[11].mxu0 }
 0x491   :  { %v4306_v10 = vmul.f32 -1.442695, %v4341_v4  ;;  %v4308_v11 = vmul.f32 -1.442695, %v4343_v5 }
 0x492   :  { %5058 = vpow2.f32 %v4305_v58 }
 0x493   :  { %5060 = vpow2.f32 %v4307_v8 }
 0x494   :  { %5097 = shalt.err (!%p5094_p4)
}
 0x495   :  { %s5098_s29 = scalar_lea.hbm %s6718_s11, 256 }
 0x496   :  { %p5099_p5 = scmp.ne.s32.totalorder %s6718_s11, %s5098_s29  ;;  %p5102_p6 = scmp.lt.u32.totalorder %s5098_s29, %s6718_s11 }
 0x498   :  { %p5104_p7 = pnand %p5102_p6, %p5099_p5 }
 0x49a   :  { %5107 = shalt.err (!%p5104_p7)
}
 0x49b   :  { %3836 = dma.vmem_to_hbm [thread:$0]  %s3834_s8, 256, %s6718_s11, [#allocation5]   ;;  %5062 = vpow2.f32 %v4306_v10  ;;  %v2528_v28 = vsub.s32 6, %v5922_v57  ;;  %v2520_v42 = vsub.s32 4, %v5922_v57  ;;  %v2524_v17 = vsub.s32 5, %v5922_v57 }
 0x49c   :  { %5064 = vpow2.f32 %v4308_v11  ;;  %v5059_v60 = vpop.eup %5058  ;;  %s5136_s11 = smov [#allocation2]  }
 0x49d   :  { %v5061_v61 = vpop.eup %5060  ;;  %v3787_v12 = vadd.f32 1.0, %v5059_v60  ;;  %v2529_v29 = vrot.slane %v6666_v54, %v2528_v28  ;;  %v2521_v31 = vrot.slane %v6666_v54, %v2520_v42  ;;  %v2525_v43 = vrot.slane %v6666_v54, %v2524_v17  ;;  %s3823_s14 = sshll.u32 %s5136_s11, 4  ;;  %s3824_s14 = int_to_ptr.vmem [resolvable:$true] %s3823_s14 }
 0x49e   :  { %v3789_v14 = vadd.f32 1.0, %v5061_v61  ;;  %s5108_s15 = scalar_lea.vmem %s3824_s14, 896  ;;  %p5113_p9 = scmp.lt.s32.totalorder %s3824_s14, %s3824_s14 }
 0x49f   :  { %5066 = vrcp.f32 %v3787_v12  ;;  %p5109_p8 = scmp.ne.s32.totalorder %s3824_s14, %s5108_s15  ;;  %p5114_p10 = scmp.lt.s32.totalorder %s5108_s15, %s5108_s15 }
 0x4a0   :  { %5068 = vrcp.f32 %v3789_v14 }
 0x4a1   :  { %p5115_p11 = por %p5114_p10, %p5113_p9 }
 0x4a3   :  { %p5116_p12 = pnand %p5115_p11, %p5109_p8 }
 0x4a5   :  { %v5063_v13 = vpop.eup %5062 }
 0x4a6   :  { %v5065_v15 = vpop.eup %5064  ;;  %v3788_v16 = vadd.f32 1.0, %v5063_v13 }
 0x4a7   :  { %v3790_v18 = vadd.f32 1.0, %v5065_v15 }
 0x4a8   :  { %5070 = vrcp.f32 %v3788_v16 }
 0x4a9   :  { %5072 = vrcp.f32 %v3790_v18  ;;  %v5067_v19 = vpop.eup %5066 }
 0x4aa   :  { %v5069_v20 = vpop.eup %5068  ;;  %3808 = vst [vmem:[#allocation2] sm:$0xff] %v5067_v19 }
 0x4ab   :  { %3810 = vst [vmem:[#allocation2 + $0x10] sm:$0xff] %v5069_v20 }
 0x4ae   :  { %v4328_v23 = vpop.f32.mrb[12].mxu0 }
 0x4af   :  { %v4329_v24 = vpop.f32.mrb[13].mxu0 }
 0x4b0   :  { %v4330_v25 = vadd.f32 %v4329_v24, %v4328_v23  ;;  %v4331_v26 = vpop.f32.mrb[14].mxu0 }
 0x4b1   :  { %v4332_v27 = vpop.f32.mrb[15].mxu0 }
 0x4b2   :  { %v5071_v21 = vpop.eup %5070  ;;  %v3721_v32 = vadd.f32 %v4330_v25, %v2529_v29 }
 0x4b3   :  { %v5073_v22 = vpop.eup %5072  ;;  %3809 = vst [vmem:[#allocation2 + $0x8] sm:$0xff] %v5071_v21 }
 0x4b4   :  { %3811 = vst [vmem:[#allocation2 + $0x18] sm:$0xff] %v5073_v22 }
 0x4d2   :  { %v3760_v33 = vpop.f32.mrb[16].mxu0 }
 0x4d3   :  { %v3761_v34 = vadd.f32 %v3760_v33, %v3721_v32  ;;  %v3762_v35 = vpop.f32.mrb[17].mxu0 }
 0x4d4   :  { %v3763_v36 = vpop.f32.mrb[18].mxu0 }
 0x4d5   :  { %v4311_v37 = vmul.f32 -1.442695, %v3761_v34  ;;  %v3764_v39 = vpop.f32.mrb[19].mxu0 }
 0x4d7   :  { %5074 = vpow2.f32 %v4311_v37 }
 0x4e1   :  { %v5075_v40 = vpop.eup %5074 }
 0x4e2   :  { %v3793_v41 = vadd.f32 1.0, %v5075_v40 }
 0x4e4   :  { %5076 = vrcp.f32 %v3793_v41 }
 0x4ee   :  { %v5077_v49 = vpop.eup %5076 }
 0x4ef   :  { %3814 = vst.msk [vmem:[#allocation2 + $0x30] sm:$0xff] %vm1252_vm0, %v5077_v49 }
 0x4f1   :  { %v3679_v44 = vpop.f32.mrb[16].mxu1 }
 0x4f2   :  { %v4344_v45 = vadd.f32 %v3679_v44, %v2521_v31  ;;  %v3681_v47 = vpop.f32.mrb[17].mxu1 }
 0x4f3   :  { %v4345_v46 = vadd.f32 %v3681_v47, %v2525_v43  ;;  %v3683_v48 = vpop.f32.mrb[18].mxu1 }
 0x4f4   :  { %v4309_v50 = vmul.f32 -1.442695, %v4344_v45  ;;  %v3684_v51 = vpop.f32.mrb[19].mxu1 }
 0x4f5   :  { %v4310_v52 = vmul.f32 -1.442695, %v4345_v46 }
 0x4f6   :  { %5078 = vpow2.f32 %v4309_v50 }
 0x4f7   :  { %5080 = vpow2.f32 %v4310_v52 }
 0x500   :  { %v5079_v53 = vpop.eup %5078 }
 0x501   :  { %v5081_v55 = vpop.eup %5080  ;;  %v3791_v57 = vadd.f32 1.0, %v5079_v53 }
 0x502   :  { %v3792_v56 = vadd.f32 1.0, %v5081_v55 }
 0x503   :  { %5082 = vrcp.f32 %v3791_v57 }
 0x504   :  { %5084 = vrcp.f32 %v3792_v56 }
 0x50d   :  { %v5083_v59 = vpop.eup %5082 }
 0x50e   :  { %v5085_v54 = vpop.eup %5084  ;;  %3812 = vst [vmem:[#allocation2 + $0x20] sm:$0xff] %v5083_v59 }
 0x50f   :  { %3813 = vst [vmem:[#allocation2 + $0x28] sm:$0xff] %v5085_v54 }
 0x510   :  { %5119 = shalt.err (!%p5116_p12)
}
 0x511   :  { %s5120_s17 = scalar_lea.hbm %s6717_s10, 896 }
 0x512   :  { %p5121_p13 = scmp.ne.s32.totalorder %s6717_s10, %s5120_s17  ;;  %p5124_p0 = scmp.lt.u32.totalorder %s5120_s17, %s6717_s10 }
 0x514   :  { %p5126_p1 = pnand %p5124_p0, %p5121_p13 }
 0x516   :  { %5129 = shalt.err (!%p5126_p1)
}
 0x517   :  { %3826 = dma.vmem_to_hbm [thread:$0]  %s3824_s14, 896, %s6717_s10, [#allocation3]  }
 0x518   :  { %5130 = dma.done.wait [#allocation3], 896  }
 0x519   :  { %5131 = vsyncadd [#allocation3], 4294966400 }
 0x51a   :  { %5132 = dma.done.wait [#allocation5], 256  }
 0x51b   :  { %5133 = vsyncadd [#allocation5], 4294967040 }
 0x51c   :  { %3843 = vsyncpa [#allocation3], 1 }
 0x51d   :  { %3844 = vsyncpa [#allocation5], 1 }

</bundles_post_ra>
